<compile_context>
chip_gen: v7x
topology: tpu7x:2x2x1
jax: 0.10.0
libtpu: 0.0.40
codegen_flags: <defaults>
</compile_context>

<pallas_src>
import math
from functools import partial

import jax
import jax.numpy as jnp
from jax.experimental import pallas as pl
from jax.experimental.pallas import tpu as pltpu


# ----------------------------------------------------------------------------
# Deterministic parameter setup: gaussian orthogonal random matrix (JAX version
# of the PyTorch helper; semantics identical, RNG is jax.random).
# ----------------------------------------------------------------------------
def _orthogonal_matrix_chunk(cols, key):
    unstructured = jax.random.normal(key, (cols, cols), dtype=jnp.float32)
    q, _ = jnp.linalg.qr(unstructured)
    return q.T


def gaussian_orthogonal_random_matrix(key, nb_rows, nb_columns, scaling=0):
    nb_full_blocks = nb_rows // nb_columns
    keys = jax.random.split(key, nb_full_blocks + 2)
    blocks = []
    for i in range(nb_full_blocks):
        blocks.append(_orthogonal_matrix_chunk(nb_columns, keys[i]))
    remaining_rows = nb_rows - nb_full_blocks * nb_columns
    if remaining_rows > 0:
        q = _orthogonal_matrix_chunk(nb_columns, keys[nb_full_blocks])
        blocks.append(q[:remaining_rows])
    final_matrix = jnp.concatenate(blocks, axis=0)
    if scaling == 0:
        multiplier = jnp.linalg.norm(
            jax.random.normal(keys[-1], (nb_rows, nb_columns), dtype=jnp.float32), axis=1
        )
    elif scaling == 1:
        multiplier = math.sqrt(float(nb_columns)) * jnp.ones((nb_rows,), dtype=jnp.float32)
    else:
        raise ValueError(f"Invalid scaling {scaling}")
    return multiplier[:, None] * final_matrix


# ----------------------------------------------------------------------------
# Pallas kernel
# ----------------------------------------------------------------------------
def enla_kernel(q_ref, k_ref, v_ref, proj_ref, o_ref, *, nb_features, eps, G, N, D):
    M_pad = proj_ref.shape[1]
    proj = proj_ref[...]                                        # (D, M_pad), f32

    # Feature mask over the lane (feature) axis.  Zeroing the padded feature
    # columns of kp alone is sufficient: the corresponding rows of ctx become
    # zero, so qp's padded columns never contribute to numerator or denominator.
    lane = jax.lax.broadcasted_iota(jnp.int32, (1, M_pad), 1)
    feat_mask = (lane < nb_features).astype(jnp.float32)        # (1, M_pad)

    def feature_map(x_ref, apply_mask):
        # One flattened projection matmul for all G heads in this grid step.
        x = x_ref[...].astype(jnp.float32).reshape(G * N, D)                 # (G*N, D)
        dash = jnp.dot(x, proj, preferred_element_type=jnp.float32)          # (G*N, M_pad)
        diag = 0.5 * jnp.sum(x * x, axis=-1, keepdims=True)                  # (G*N, 1)
        # `ratio` scaling from the reference cancels exactly between numerator
        # and denominator, so it is dropped here.
        feat = jnp.exp(dash - diag) + eps
        if apply_mask:
            feat = feat * feat_mask
        return feat.reshape(G, N, M_pad)

    qp = feature_map(q_ref, apply_mask=False)                   # (G, N, M_pad) f32
    kp = feature_map(k_ref, apply_mask=True)                    # (G, N, M_pad) f32

    # v arrives pre-augmented ([v | 1]) and pre-cast to bf16 from the wrapper.
    v_aug = v_ref[...]                                          # (G, N, D+1) bf16

    # ctx[g] = kp[g]^T @ [v[g] | 1]  -> (G, M_pad, D+1)
    # Contraction directly over N (Mosaic transposed-operand MXU path); bf16
    # operands, f32 accumulation.  The last column is the per-feature k-sum.
    ctx = jnp.einsum(
        "gnm,gne->gme",
        kp.astype(jnp.bfloat16),
        v_aug,
        preferred_element_type=jnp.float32,
    )

    # out_aug[g] = qp[g] @ ctx[g]  -> (G, N, D+1); last column = denominator.
    out_aug = jnp.einsum(
        "gnm,gme->gne",
        qp.astype(jnp.bfloat16),
        ctx.astype(jnp.bfloat16),
        preferred_element_type=jnp.float32,
    )

    num = out_aug[:, :, :D]                                     # (G, N, D)
    denom = out_aug[:, :, D:D + 1]                              # (G, N, 1)
    out = num * pl.reciprocal(denom, approx=True)               # EUP reciprocal

    # Single full-width unmasked store: pack the G heads along the lane axis in
    # registers (lane concat uses VPU/XLU slack) and write the (N, G*D) slab
    # once, instead of G masked D-lane stores.
    packed = jnp.concatenate([out[g] for g in range(G)], axis=-1)   # (N, G*D)
    o_ref[0] = packed.astype(o_ref.dtype)


# ----------------------------------------------------------------------------
# Wrapper
# ----------------------------------------------------------------------------
def _vmem_budget_bytes():
    # Generation-aware VMEM budget: ~70% of physical per-core VMEM
    # (v5e/v6e: ~90 MiB of 128 MiB; v7x: ~45 MiB of 64 MiB).  Falls back to the
    # v7x floor if the query is unavailable, which is safe on every generation.
    cap_bytes = 64 * 1024 * 1024
    try:
        info = pltpu.get_tpu_info()
        cap = getattr(info, "vmem_capacity_bytes", None)
        if cap:
            cap_bytes = int(cap)
    except Exception:
        pass
    return int(cap_bytes * 0.70)


def _pick_heads_per_step(BH, N, D, M_pad, vmem_budget):
    # Per-head VMEM estimate (bytes), including double-buffered q/k/v/out blocks,
    # f32 qp/kp plus their bf16 copies, ctx (f32 + bf16) and out_aug/out temps.
    per_head = (
        24 * N * D                 # q,k f32 blocks (x2 double-buffered) + out block
        + 12 * N * M_pad           # qp,kp f32 + bf16 copies
        + 20 * N * (D + 1)         # v_aug bf16 (x2), out_aug f32, num/out temps
        + 6 * M_pad * (D + 1)      # ctx f32 + bf16
    )
    cap = max(1, vmem_budget // per_head)
    g_min = 128 // math.gcd(D, 128)        # smallest G with G*D % 128 == 0

    def score(g):
        steps = BH // g
        return (
            g <= cap,              # fits the VMEM budget
            g % g_min == 0,        # G*D multiple of 128 -> lane-dense output slab
            steps >= 4,            # >= 2 grid steps per TensorCore on v7x
            steps % 2 == 0,        # balanced megacore split
            steps >= 2,            # at least use both v7x TensorCores
            g,                     # then the largest G (amortize per-step overhead)
        )

    return max((g for g in range(1, BH + 1) if BH % g == 0), key=score)


def enla_forward(q, k, v, proj, *, eps=1e-4, heads_per_step=None):
    """q, k, v: (B, H, N, D) float32; proj: (M, D) float32 -> (B, H, N, D)."""
    B, H, N, D = q.shape
    M = proj.shape[0]
    BH = B * H
    M_pad = ((M + 127) // 128) * 128   # round features up to a full lane width

    vmem_budget = _vmem_budget_bytes()
    G = (heads_per_step if heads_per_step is not None
         else _pick_heads_per_step(BH, N, D, M_pad, vmem_budget))
    assert BH % G == 0
    n_groups = BH // G

    # Pre-transpose + zero-pad projection to (D, M_pad): lane-dense, perfectly
    # (8,128)-tiled MXU operand; padded columns are masked inside the kernel.
    proj_t = jnp.zeros((D, M_pad), jnp.float32).at[:, :M].set(proj.T.astype(jnp.float32))

    qf = q.reshape(BH, N, D)
    kf = k.reshape(BH, N, D)
    # v is only consumed as a bf16 MXU operand: pre-cast and pre-append the
    # denominator ones column here (halves v's DMA bytes, removes an in-kernel
    # full-tensor cast and lane-axis concatenate).
    vf = jnp.concatenate(
        [v.reshape(BH, N, D), jnp.ones((BH, N, 1), v.dtype)], axis=-1
    ).astype(jnp.bfloat16)

    head_spec = pl.BlockSpec((G, N, D), lambda i: (i, 0, 0))
    vaug_spec = pl.BlockSpec((G, N, D + 1), lambda i: (i, 0, 0))
    proj_spec = pl.BlockSpec((D, M_pad), lambda i: (0, 0))
    out_spec = pl.BlockSpec((1, N, G * D), lambda i: (i, 0, 0))

    out = pl.pallas_call(
        partial(enla_kernel, nb_features=M, eps=eps, G=G, N=N, D=D),
        out_shape=jax.ShapeDtypeStruct((n_groups, N, G * D), q.dtype),
        grid_spec=pltpu.PrefetchScalarGridSpec(
            num_scalar_prefetch=0,
            grid=(n_groups,),
            in_specs=[head_spec, head_spec, vaug_spec, proj_spec],
            out_specs=out_spec,
        ),
        compiler_params=pltpu.CompilerParams(
            dimension_semantics=("parallel",),
            vmem_limit_bytes=vmem_budget,
        ),
    )(qf, kf, vf, proj_t)

    # Undo the lane-dense head packing: (n_groups, N, G*D) -> (B, H, N, D).
    # (If downstream can consume (B, N, H*D) directly this transpose can be
    # dropped; the module spec returns (B, H, N, D), so we unpack here.)
    out = out.reshape(n_groups, N, G, D).transpose(0, 2, 1, 3).reshape(B, H, N, D)
    return out


# ----------------------------------------------------------------------------
# Pure-JAX reference (mirrors the PyTorch forward exactly; attn_drop p=0.0 is identity).
# ----------------------------------------------------------------------------
def enla_reference(q, k, v, proj, eps=1e-4):
    m = proj.shape[0]
    ratio = float(m) ** -0.5

    def softmax_kernel(data):
        data_dash = jnp.einsum("bhid,jd->bhij", data, proj)
        diag = 0.5 * jnp.sum(data ** 2, axis=-1, keepdims=True)
        return ratio * (jnp.exp(data_dash - diag) + eps)

    qp = softmax_kernel(q)
    kp = softmax_kernel(k)
    k_cumsum = kp.sum(axis=-2)                                  # (B,H,M)
    d_inv = 1.0 / jnp.einsum("bhnm,bhm->bhn", qp, k_cumsum)     # (B,H,N)
    context = jnp.einsum("bhnm,bhne->bhme", kp, v)              # (B,H,M,D)
    out = jnp.einsum("bhme,bhnm,bhn->bhne", context, qp, d_inv)
    return out


if __name__ == "__main__":
    # Small shapes consistent with the module: dim_heads=32 -> nb_features=int(32*log(32))=110
    B, H, N, D = 2, 4, 64, 32
    nb_features = int(D * math.log(D))  # 110

    key = jax.random.PRNGKey(0)
    kq, kk, kv, kp = jax.random.split(key, 4)
    q = 0.5 * jax.random.normal(kq, (B, H, N, D), dtype=jnp.float32)
    k = 0.5 * jax.random.normal(kk, (B, H, N, D), dtype=jnp.float32)
    v = jax.random.normal(kv, (B, H, N, D), dtype=jnp.float32)

    proj = gaussian_orthogonal_random_matrix(kp, nb_features, D, scaling=0)

    out = jax.block_until_ready(enla_forward(q, k, v, proj))
    ref = jax.block_until_ready(enla_reference(q, k, v, proj))

    assert out.shape == (B, H, N, D)
    err = float(jnp.max(jnp.abs(out - ref)))
    # bf16 MXU operands on the attention matmuls + approx reciprocal -> loosened tolerance.
    assert jnp.allclose(out, ref, rtol=3e-2, atol=3e-2), err

    print("KERNEL_OK")
</pallas_src>

<mosaic_0001>
module attributes {stable_mosaic.version = 11 : i64} {
  func.func @enla_kernel(%arg0: i32, %arg1: memref<4x64x32xf32, #tpu.memory_space<vmem>>, %arg2: memref<4x64x32xf32, #tpu.memory_space<vmem>>, %arg3: memref<4x64x33xbf16, #tpu.memory_space<vmem>>, %arg4: memref<32x128xf32, #tpu.memory_space<vmem>>, %arg5: memref<1x64x128xf32, #tpu.memory_space<vmem>>) attributes {dimension_semantics = [#tpu.dimension_semantics<parallel>], iteration_bounds = array<i64: 2>, scalar_prefetch = 0 : i64, scratch_operands = 0 : i64, tpu.core_type = #tpu.core_type<tc>, window_params = [{transform_indices = @transform_0, window_bounds = array<i64: 4, 64, 32>}, {transform_indices = @transform_1, window_bounds = array<i64: 4, 64, 32>}, {transform_indices = @transform_2, window_bounds = array<i64: 4, 64, 33>}, {pipeline_mode = #tpu.pipeline_mode<synchronous>, transform_indices = @transform_3, window_bounds = array<i64: 32, 128>}, {transform_indices = @transform_4, window_bounds = array<i64: 1, 64, 128>}]} {
    %c0 = arith.constant 0 : index
    %c0_0 = arith.constant 0 : index
    %0 = vector.load %arg4[%c0, %c0_0] : memref<32x128xf32, #tpu.memory_space<vmem>>, vector<32x128xf32>
    %1 = tpu.iota {dimensions = array<i32: 1>} : vector<1x128xi32>
    %c110_i32 = arith.constant 110 : i32
    %2 = vector.broadcast %c110_i32 : i32 to vector<1x128xi32>
    %3 = arith.cmpi slt, %1, %2 : vector<1x128xi32>
    %4 = arith.extui %3 : vector<1x128xi1> to vector<1x128xi32>
    %5 = arith.sitofp %4 : vector<1x128xi32> to vector<1x128xf32>
    %c0_1 = arith.constant 0 : index
    %c0_2 = arith.constant 0 : index
    %c0_3 = arith.constant 0 : index
    %6 = vector.load %arg1[%c0_1, %c0_2, %c0_3] : memref<4x64x32xf32, #tpu.memory_space<vmem>>, vector<4x64x32xf32>
    %7 = vector.shape_cast %6 : vector<4x64x32xf32> to vector<256x32xf32>
    %cst = arith.constant dense<0.000000e+00> : vector<256x128xf32>
    %8 = tpu.matmul %7, %0, %cst {dimension_numbers = #tpu.dot_dimension_numbers<[1], [0], [0], [1], [0, 0, 1, 1], [], []>} : vector<256x32xf32>, vector<32x128xf32>, vector<256x128xf32> -> vector<256x128xf32>
    %9 = arith.mulf %7, %7 : vector<256x32xf32>
    %cst_4 = arith.constant dense<0.000000e+00> : vector<256xf32>
    %10 = vector.multi_reduction <add>, %9, %cst_4 [1] : vector<256x32xf32> to vector<256xf32>
    %11 = vector.shape_cast %10 : vector<256xf32> to vector<256x1xf32>
    %cst_5 = arith.constant 5.000000e-01 : f32
    %12 = vector.broadcast %cst_5 : f32 to vector<256x1xf32>
    %13 = arith.mulf %12, %11 : vector<256x1xf32>
    %14 = vector.broadcast %13 : vector<256x1xf32> to vector<256x128xf32>
    %15 = arith.subf %8, %14 : vector<256x128xf32>
    %16 = math.exp %15 : vector<256x128xf32>
    %cst_6 = arith.constant 9.99999974E-5 : f32
    %17 = vector.broadcast %cst_6 : f32 to vector<256x128xf32>
    %18 = arith.addf %16, %17 : vector<256x128xf32>
    %19 = vector.shape_cast %18 : vector<256x128xf32> to vector<4x64x128xf32>
    %c0_7 = arith.constant 0 : index
    %c0_8 = arith.constant 0 : index
    %c0_9 = arith.constant 0 : index
    %20 = vector.load %arg2[%c0_7, %c0_8, %c0_9] : memref<4x64x32xf32, #tpu.memory_space<vmem>>, vector<4x64x32xf32>
    %21 = vector.shape_cast %20 : vector<4x64x32xf32> to vector<256x32xf32>
    %cst_10 = arith.constant dense<0.000000e+00> : vector<256x128xf32>
    %22 = tpu.matmul %21, %0, %cst_10 {dimension_numbers = #tpu.dot_dimension_numbers<[1], [0], [0], [1], [0, 0, 1, 1], [], []>} : vector<256x32xf32>, vector<32x128xf32>, vector<256x128xf32> -> vector<256x128xf32>
    %23 = arith.mulf %21, %21 : vector<256x32xf32>
    %cst_11 = arith.constant dense<0.000000e+00> : vector<256xf32>
    %24 = vector.multi_reduction <add>, %23, %cst_11 [1] : vector<256x32xf32> to vector<256xf32>
    %25 = vector.shape_cast %24 : vector<256xf32> to vector<256x1xf32>
    %cst_12 = arith.constant 5.000000e-01 : f32
    %26 = vector.broadcast %cst_12 : f32 to vector<256x1xf32>
    %27 = arith.mulf %26, %25 : vector<256x1xf32>
    %28 = vector.broadcast %27 : vector<256x1xf32> to vector<256x128xf32>
    %29 = arith.subf %22, %28 : vector<256x128xf32>
    %30 = math.exp %29 : vector<256x128xf32>
    %cst_13 = arith.constant 9.99999974E-5 : f32
    %31 = vector.broadcast %cst_13 : f32 to vector<256x128xf32>
    %32 = arith.addf %30, %31 : vector<256x128xf32>
    %33 = vector.broadcast %5 : vector<1x128xf32> to vector<256x128xf32>
    %34 = arith.mulf %32, %33 : vector<256x128xf32>
    %35 = vector.shape_cast %34 : vector<256x128xf32> to vector<4x64x128xf32>
    %c0_14 = arith.constant 0 : index
    %c0_15 = arith.constant 0 : index
    %c0_16 = arith.constant 0 : index
    %36 = vector.load %arg3[%c0_14, %c0_15, %c0_16] : memref<4x64x33xbf16, #tpu.memory_space<vmem>>, vector<4x64x33xbf16>
    %37 = arith.truncf %35 : vector<4x64x128xf32> to vector<4x64x128xbf16>
    "tpu.trace_start"() <{level = 10 : i32, message = "gnm,gne->gme"}> : () -> ()
    %cst_17 = arith.constant dense<0.000000e+00> : vector<4x128x33xf32>
    %38 = tpu.matmul %37, %36, %cst_17 {dimension_numbers = #tpu.dot_dimension_numbers<[1], [1], [2], [2], [0, 0, 0, 2, 1, 2], [0], [0]>} : vector<4x64x128xbf16>, vector<4x64x33xbf16>, vector<4x128x33xf32> -> vector<4x128x33xf32>
    "tpu.trace_stop"() : () -> ()
    %39 = arith.truncf %19 : vector<4x64x128xf32> to vector<4x64x128xbf16>
    %40 = arith.truncf %38 : vector<4x128x33xf32> to vector<4x128x33xbf16>
    "tpu.trace_start"() <{level = 10 : i32, message = "gnm,gme->gne"}> : () -> ()
    %cst_18 = arith.constant dense<0.000000e+00> : vector<4x64x33xf32>
    %41 = tpu.matmul %39, %40, %cst_18 {dimension_numbers = #tpu.dot_dimension_numbers<[2], [1], [1], [2], [0, 0, 0, 1, 1, 2], [0], [0]>} : vector<4x64x128xbf16>, vector<4x128x33xbf16>, vector<4x64x33xf32> -> vector<4x64x33xf32>
    "tpu.trace_stop"() : () -> ()
    %42 = vector.extract_strided_slice %41 {offsets = [0, 0, 0], sizes = [4, 64, 32], strides = [1, 1, 1]} : vector<4x64x33xf32> to vector<4x64x32xf32>
    %43 = vector.extract_strided_slice %41 {offsets = [0, 0, 32], sizes = [4, 64, 1], strides = [1, 1, 1]} : vector<4x64x33xf32> to vector<4x64x1xf32>
    %44 = tpu.reciprocal %43 {approx = true} : vector<4x64x1xf32> -> vector<4x64x1xf32>
    %45 = vector.broadcast %44 : vector<4x64x1xf32> to vector<4x64x32xf32>
    %46 = arith.mulf %42, %45 : vector<4x64x32xf32>
    %47 = vector.extract_strided_slice %46 {offsets = [0, 0, 0], sizes = [1, 64, 32], strides = [1, 1, 1]} : vector<4x64x32xf32> to vector<1x64x32xf32>
    %48 = vector.shape_cast %47 : vector<1x64x32xf32> to vector<64x32xf32>
    %49 = vector.extract_strided_slice %46 {offsets = [1, 0, 0], sizes = [1, 64, 32], strides = [1, 1, 1]} : vector<4x64x32xf32> to vector<1x64x32xf32>
    %50 = vector.shape_cast %49 : vector<1x64x32xf32> to vector<64x32xf32>
    %51 = vector.extract_strided_slice %46 {offsets = [2, 0, 0], sizes = [1, 64, 32], strides = [1, 1, 1]} : vector<4x64x32xf32> to vector<1x64x32xf32>
    %52 = vector.shape_cast %51 : vector<1x64x32xf32> to vector<64x32xf32>
    %53 = vector.extract_strided_slice %46 {offsets = [3, 0, 0], sizes = [1, 64, 32], strides = [1, 1, 1]} : vector<4x64x32xf32> to vector<1x64x32xf32>
    %54 = vector.shape_cast %53 : vector<1x64x32xf32> to vector<64x32xf32>
    %55 = tpu.concatenate %48, %50, %52, %54 in 1 : vector<64x32xf32>, vector<64x32xf32>, vector<64x32xf32>, vector<64x32xf32> -> vector<64x128xf32>
    %c0_19 = arith.constant 0 : index
    %c0_20 = arith.constant 0 : index
    %c0_21 = arith.constant 0 : index
    %56 = vector.load %arg5[%c0_19, %c0_20, %c0_21] : memref<1x64x128xf32, #tpu.memory_space<vmem>>, vector<1x64x128xf32>
    %57 = vector.shape_cast %56 : vector<1x64x128xf32> to vector<64x128xf32>
    %58 = vector.shape_cast %55 : vector<64x128xf32> to vector<1x64x128xf32>
    tpu.vector_store %arg5[%c0_19, %c0_20, %c0_21], %58 {strides = array<i32>} : memref<1x64x128xf32, #tpu.memory_space<vmem>>, vector<1x64x128xf32>,
    return
  }
  func.func @transform_0(%arg0: i32) -> (i32, i32, i32) {
    %c0_i32 = arith.constant 0 : i32
    %c0_i32_0 = arith.constant 0 : i32
    %c0_i32_1 = arith.constant 0 : i32
    return %arg0, %c0_i32, %c0_i32_0 : i32, i32, i32
  }
  func.func @transform_1(%arg0: i32) -> (i32, i32, i32) {
    %c0_i32 = arith.constant 0 : i32
    %c0_i32_0 = arith.constant 0 : i32
    %c0_i32_1 = arith.constant 0 : i32
    return %arg0, %c0_i32, %c0_i32_0 : i32, i32, i32
  }
  func.func @transform_2(%arg0: i32) -> (i32, i32, i32) {
    %c0_i32 = arith.constant 0 : i32
    %c0_i32_0 = arith.constant 0 : i32
    %c0_i32_1 = arith.constant 0 : i32
    return %arg0, %c0_i32, %c0_i32_0 : i32, i32, i32
  }
  func.func @transform_3(%arg0: i32) -> (i32, i32) {
    %c0_i32 = arith.constant 0 : i32
    %c0_i32_0 = arith.constant 0 : i32
    %c0_i32_1 = arith.constant 0 : i32
    return %c0_i32, %c0_i32_0 : i32, i32
  }
  func.func @transform_4(%arg0: i32) -> (i32, i32, i32) {
    %c0_i32 = arith.constant 0 : i32
    %c0_i32_0 = arith.constant 0 : i32
    %c0_i32_1 = arith.constant 0 : i32
    return %arg0, %c0_i32, %c0_i32_0 : i32, i32, i32
  }
}

</mosaic_0001>

<bundles_post_ra>
// kernel: tpu_custom_call.1
= control target key start
LH: loop header
LB: loop body
LE: loop exit
PB: predicated region body
PF: predicated region fallthrough
CT: control target
= control target key end

     0   :  { %9 = vsyncpa [#allocation3], 0  ;;  %s5067_s0 = inlined_call_operand.vmem [shape: f32[8,64,32], index: 0, kind: input, shape index: {}]   ;;  %s5068_s1 = inlined_call_operand.vmem [shape: f32[8,64,32], index: 1, kind: input, shape index: {}]   ;;  %s5069_s2 = inlined_call_operand.vmem [shape: bf16[8,64,33], index: 2, kind: input, shape index: {}]   ;;  %s5070_s3 = inlined_call_operand.vmem [shape: f32[32,128], index: 3, kind: input, shape index: {}]   ;;  %s5071_s4 = inlined_call_operand.hbm [shape: f32[2,64,128], index: 4, kind: output, shape index: {}]  }
   0x1   :  { %11 = vsyncpa [#allocation3 + $0x1], 0  ;;  %s4008_s15 = smov 0   ;;  %s4010_s16 = smov 0  }
   0x2   :  { %s4012_s17 = smov 0   ;;  %s4014_s18 = smov 0  }
   0x3 LB: > { %s4029_s19 = sadd.s32 4294967295, %s3973_s18   ;;  %s3030_s20 = sadd.s32 4294967294, %s3973_s18   ;;  %s3973_s18 = sphi %s4014_s18, %s5086_s18   ;;  %s3969_s17 = sphi %s4012_s17, %s5085_s17   ;;  %s3965_s16 = sphi %s4010_s16, %s5084_s16   ;;  %s3961_s15 = sphi %s4008_s15, %s5083_s15  }
   0x4   : > { %s4033_s21 = sadd.s32 1, %s3973_s18   ;;  %s123_s22 = sadd.s32 1, %s3969_s17 }
   0x5   : > { %s120_s23 = ssub.s32 %s3973_s18, %s4033_s21  ;;  %p133_p0 = scmp.ne.s32.totalorder %s3969_s17, %s3965_s16 }
   0x6   : > { %p121_p1 = scmp.eq.s32.totalorder %s120_s23, 0  ;;  %p134_p2 = scmp.eq.s32.totalorder %s4029_s19, 1 }
   0x7   : > { %p139_p3 = scmp.ne.s32.totalorder %s3965_s16, %s3961_s15  ;;  %p140_p4 = scmp.eq.s32.totalorder %s3030_s20, 1 }
   0x8   : > { %s4044_s24 = scalar_select %p121_p1, %s3969_s17, %s123_s22  }
   0x9   : > { %p4046_p5 = por %p134_p2, %p133_p0  ;;  %p4050_p6 = por %p140_p4, %p139_p3 }
   0xa   : > { %p3033_p7 = scmp.ge.s32.totalorder %s3973_s18, 1  ;;  %p191_p8 = scmp.lt.s32.totalorder %s3973_s18, 3 }
   0xc   : > { %p192_p9 = pnand %p3033_p7, %p191_p8 }
   0xe   : > { %195 = sbr.rel (%p192_p9) target bundleno = 1178 (0x49a), region = 36 }
  0x15   : > { %v252_v0 = vld [vmem:[%s5070_s3] sm:$0xff]  ;;  %v253_v1 = vld [vmem:[%s5070_s3 + $0x8] sm:$0xff]  ;;  %v254_v2 = vld [vmem:[%s5070_s3 + $0x10] sm:$0xff]  ;;  %s3035_s7 = sshll.u32 %s4029_s19, 2  ;;  %vm293_vm0 = vcmask 261120   ;;  %vm1664_vm2 = vcmask 523264  }
  0x16   : > { %v3638_v3 = vpack.c.bf16 %v253_v1, %v252_v0  ;;  %v255_v4 = vld [vmem:[%s5070_s3 + $0x18] sm:$0xff]  ;;  %p231_p10 = scmp.lt.s32.totalorder %s3035_s7, 7  ;;  %s3977_s30 = smov 32   ;;  %vm2913_vm3 = vcmask 785408  }
  0x17   : > { %v3642_v5 = vpack.c.bf16 %v255_v4, %v254_v2  ;;  %s3978_s5 = smov 64   ;;  %s3979_s6 = smov 96  }
  0x18   : > { %3647 = vmatprep.subr.bf16.mxu1 %v3638_v3  ;;  %s5088_s7 = smov (!%p231_p10, %s3035_s7), 7  ;;  %3639 = vmatprep.subr.bf16.mxu0 %v3638_v3 }
  0x19   : > { %3649 = vmatpush3.bf16.msra.mxu1 %v3638_v3  ;;  %3641 = vmatpush3.bf16.msra.mxu0 %v3638_v3  ;;  %s3162_s10 = sshll.u32 %s5088_s7, 6  ;;  %s3164_s23 = sshll.u32 %s5088_s7, 5 }
  0x1a   : > { %3651 = vmatprep.subr.bf16.mxu1 %v3642_v5  ;;  %3643 = vmatprep.subr.bf16.mxu0 %v3642_v5  ;;  %s4077_s13 = scalar_lea.vmem %s5068_s1, %s3162_s10  ;;  %s4180_s22 = scalar_lea.vmem %s5067_s0, %s3162_s10 }
  0x1b   : > { %v903_v6 = vld [vmem:[%s4077_s13] sm:$0xff]  ;;  %v904_v7 = vld [vmem:[%s4077_s13 + $0x8] sm:$0xff]  ;;  %v905_v10 = vld [vmem:[%s4077_s13 + $0x10] sm:$0xff]  ;;  %s4226_s29 = scalar_lea.vmem %s5069_s2, %s3164_s23  ;;  %s227_s7 = sand.u32 1, %s3965_s16  }
  0x1c   : > { %3398 = vmatprep.mubr.msk.f32.mxu1 %vm293_vm0, %v903_v6  ;;  %v1256_v8 = vmul.f32 %v903_v6, %v903_v6  ;;  %v1257_v9 = vmul.f32 %v904_v7, %v904_v7  ;;  %v911_v11 = vld [vmem:[%s4077_s13 + $0x40] sm:$0xff]  ;;  %v912_v12 = vld [vmem:[%s4077_s13 + $0x48] sm:$0xff]  ;;  %v906_v16 = vld [vmem:[%s4077_s13 + $0x18] sm:$0xff]  ;;  %v1258_v19 = vmul.f32 %v905_v10, %v905_v10  ;;  %s3034_s8 = sshll.u32 %s227_s7, 6  ;;  %s3165_s10 = sshll.u32 %s4029_s19, 10 }
  0x1d   : > { %3653 = vmatpush3.bf16.msra.mxu1 %v3642_v5  ;;  %3645 = vmatpush3.bf16.msra.mxu0 %v3642_v5  ;;  %v1264_v13 = vmul.f32 %v911_v11, %v911_v11  ;;  %v1265_v15 = vmul.f32 %v912_v12, %v912_v12  ;;  %v907_v20 = vld [vmem:[%s4077_s13 + $0x20] sm:$0xff]  ;;  %v1259_v22 = vmul.f32 %v906_v16, %v906_v16  ;;  %v913_v23 = vld [vmem:[%s4077_s13 + $0x50] sm:$0xff]  ;;  %v908_v24 = vld [vmem:[%s4077_s13 + $0x28] sm:$0xff]  ;;  %s4977_s9 = scalar_lea.vmem [#allocation2], %s3034_s8  ;;  %s5017_s14 = scalar_lea.hbm %s5071_s4, %s3165_s10 }
  0x1e   : > { %v1288_v14 = vsel %vm293_vm0, %v1256_v8, 0.0  ;;  %v1291_v18 = vsel %vm293_vm0, %v1257_v9, 0.0  ;;  %v1294_v25 = vsel %vm293_vm0, %v1258_v19, 0.0  ;;  %v1266_v26 = vmul.f32 %v913_v23, %v913_v23  ;;  %v909_v27 = vld [vmem:[%s4077_s13 + $0x30] sm:$0xff]  ;;  %v914_v28 = vld [vmem:[%s4077_s13 + $0x58] sm:$0xff]  ;;  %v915_v36 = vld [vmem:[%s4077_s13 + $0x60] sm:$0xff] }
  0x1f   : > { %1289 = vadd.xlane.f32.xlu0 %v1288_v14  ;;  %v1312_v17 = vsel %vm293_vm0, %v1264_v13, 0.0  ;;  %v1315_v21 = vsel %vm293_vm0, %v1265_v15, 0.0  ;;  %v1297_v29 = vsel %vm293_vm0, %v1259_v22, 0.0  ;;  %v1267_v30 = vmul.f32 %v914_v28, %v914_v28  ;;  %v910_v31 = vld [vmem:[%s4077_s13 + $0x38] sm:$0xff]  ;;  %v916_v39 = vld [vmem:[%s4077_s13 + $0x68] sm:$0xff]  ;;  %v917_v46 = vld [vmem:[%s4077_s13 + $0x70] sm:$0xff] }
  0x20   : > { %3399 = vmatmul.mubr.msk.f32.vlgmr.msra.gmra.mrb[0].mxu1 %vm293_vm0, %v904_v7  ;;  %1313 = vadd.xlane.f32.xlu1 %v1312_v17  ;;  %v1318_v32 = vsel %vm293_vm0, %v1266_v26, 0.0  ;;  %v1260_v33 = vmul.f32 %v907_v20, %v907_v20  ;;  %v1261_v35 = vmul.f32 %v908_v24, %v908_v24  ;;  %v1268_v38 = vmul.f32 %v915_v36, %v915_v36  ;;  %v918_v49 = vld [vmem:[%s4077_s13 + $0x78] sm:$0xff]  ;;  %v919_v52 = vld [vmem:[%s4077_s13 + $0x80] sm:$0xff]  ;;  %v920_v55 = vld [vmem:[%s4077_s13 + $0x88] sm:$0xff]  ;;  %s2944_s11 = sshll.u32 %s4977_s9, 4  ;;  %s5026_s19 = scalar_lea.sflag [#allocation3], %s227_s7  ;;  %s5019_s11 = int_to_ptr.vmem [resolvable:$true] %s2944_s11 }
  0x21   : > { %3401 = vmatprep.mubr.msk.f32.mxu1 %vm293_vm0, %v905_v10  ;;  %v1321_v34 = vsel %vm293_vm0, %v1267_v30, 0.0  ;;  %v1269_v41 = vmul.f32 %v916_v39, %v916_v39  ;;  %v1262_v43 = vmul.f32 %v909_v27, %v909_v27  ;;  %v1263_v45 = vmul.f32 %v910_v31, %v910_v31  ;;  %v927_v58 = vld [vmem:[%s4077_s13 + $0xc0] sm:$0xff]  ;;  %v921_v61 = vld [vmem:[%s4077_s13 + $0x90] sm:$0xff]  ;;  %v928_v62 = vld [vmem:[%s4077_s13 + $0xc8] sm:$0xff]  ;;  %s3911_s20 = scalar_lea.vmem %s5019_s11, 1024 }
  0x22   : > { %v1300_v37 = vsel %vm293_vm0, %v1260_v33, 0.0  ;;  %v1303_v40 = vsel %vm293_vm0, %v1261_v35, 0.0  ;;  %v1324_v42 = vsel %vm293_vm0, %v1268_v38, 0.0  ;;  %v1270_v48 = vmul.f32 %v917_v46, %v917_v46  ;;  %v922_v1 = vld [vmem:[%s4077_s13 + $0x98] sm:$0xff]  ;;  %v923_v4 = vld [vmem:[%s4077_s13 + $0xa0] sm:$0xff]  ;;  %v929_v7 = vld [vmem:[%s4077_s13 + $0xd0] sm:$0xff]  ;;  %p3912_p11 = scmp.ne.s32.totalorder %s5019_s11, %s3911_s20 }
  0x23   : > { %1292 = vadd.xlane.f32.xlu0 %v1291_v18  ;;  %v1327_v44 = vsel %vm293_vm0, %v1269_v41, 0.0  ;;  %v1306_v47 = vsel %vm293_vm0, %v1262_v43, 0.0  ;;  %v1309_v50 = vsel %vm293_vm0, %v1263_v45, 0.0  ;;  %v1271_v51 = vmul.f32 %v918_v49, %v918_v49  ;;  %v924_v8 = vld [vmem:[%s4077_s13 + $0xa8] sm:$0xff]  ;;  %v926_v15 = vld [vmem:[%s4077_s13 + $0xb8] sm:$0xff]  ;;  %v933_v30 = vld [vmem:[%s4077_s13 + $0xf0] sm:$0xff] }
  0x24   : > { %3402 = vmatmul.mubr.msk.f32.gmra.mrb[2].mxu1 %vm293_vm0, %v906_v16  ;;  %1316 = vadd.xlane.f32.xlu1 %v1315_v21  ;;  %v1330_v53 = vsel %vm293_vm0, %v1270_v48, 0.0  ;;  %v1272_v54 = vmul.f32 %v919_v52, %v919_v52  ;;  %v1273_v57 = vmul.f32 %v920_v55, %v920_v55  ;;  %v1280_v60 = vmul.f32 %v927_v58, %v927_v58  ;;  %v934_v33 = vld [vmem:[%s4077_s13 + $0xf8] sm:$0xff]  ;;  %v4183_v38 = vld [vmem:[%s4180_s22] sm:$0xff]  ;;  %v4208_v43 = vld [vmem:[%s4180_s22 + $0x28] sm:$0xff]  ;;  %p3913_p12 = pnand %p3912_p11, %p4046_p5 }
  0x25   : > { %3404 = vmatprep.mubr.msk.f32.mxu1 %vm293_vm0, %v907_v20  ;;  %v1333_v56 = vsel %vm293_vm0, %v1271_v51, 0.0  ;;  %v1281_v0 = vmul.f32 %v928_v62, %v928_v62  ;;  %v1274_v3 = vmul.f32 %v921_v61, %v921_v61  ;;  %v1275_v6 = vmul.f32 %v922_v1, %v922_v1  ;;  %v931_v20 = vld [vmem:[%s4077_s13 + $0xe0] sm:$0xff]  ;;  %3342 = vmatprep.mubr.msk.f32.mxu0 %vm293_vm0, %v4183_v38  ;;  %v4198_v41 = vld [vmem:[%s4180_s22 + $0x18] sm:$0xff]  ;;  %v4233_v48 = vld [vmem:[%s4180_s22 + $0x48] sm:$0xff] }
  0x26   : > { %v1336_v59 = vsel %vm293_vm0, %v1272_v54, 0.0  ;;  %v1339_v63 = vsel %vm293_vm0, %v1273_v57, 0.0  ;;  %v1360_v2 = vsel %vm293_vm0, %v1280_v60, 0.0  ;;  %v1282_v10 = vmul.f32 %v929_v7, %v929_v7  ;;  %v4218_v45 = vld [vmem:[%s4180_s22 + $0x38] sm:$0xff]  ;;  %v3705_v54 = vld [vmem:[%s4226_s29 + $0x20] sm:$0xff]   ;;  %p3914_p13 = pneg %p3913_p12 }
  0x27   : > { %1295 = vadd.xlane.f32.xlu0 %v1294_v25  ;;  %v1363_v5 = vsel %vm293_vm0, %v1281_v0, 0.0  ;;  %v1342_v9 = vsel %vm293_vm0, %v1274_v3, 0.0  ;;  %v1345_v13 = vsel %vm293_vm0, %v1275_v6, 0.0  ;;  %v1276_v17 = vmul.f32 %v923_v4, %v923_v4  ;;  %3470 = vmatprep.subr.bf16.mxu1 %v3705_v54 }
  0x28   : > { %3405 = vmatmul.mubr.msk.f32.gmra.mrb[4].mxu1 %vm293_vm0, %v908_v24  ;;  %1298 = vadd.xlane.f32.xlu1 %v1297_v29  ;;  %v1366_v16 = vsel %vm293_vm0, %v1282_v10, 0.0  ;;  %v1277_v19 = vmul.f32 %v924_v8, %v924_v8  ;;  %v1284_v22 = vmul.f32 %v931_v20, %v931_v20  ;;  %v1279_v29 = vmul.f32 %v926_v15, %v926_v15  ;;  %v4311_v10 = vld [vmem:[%s4180_s22 + $0xa8] sm:$0xff] }
  0x29   : > { %3407 = vmatprep.mubr.msk.f32.mxu1 %vm293_vm0, %v909_v27  ;;  %v1348_v21 = vsel %vm293_vm0, %v1276_v17, 0.0  ;;  %v1287_v35 = vmul.f32 %v934_v33, %v934_v33  ;;  %3471 = vmatpush3.bf16.msra.mxu1 %v3705_v54  ;;  %v4333_v17 = vld [vmem:[%s4180_s22 + $0xc8] sm:$0xff] }
  0x2a   : > { %v1351_v24 = vsel %vm293_vm0, %v1277_v19, 0.0  ;;  %v1372_v26 = vsel %vm293_vm0, %v1284_v22, 0.0  ;;  %v4338_v19 = vld [vmem:[%s4180_s22 + $0xd0] sm:$0xff]  ;;  %v4348_v22 = vld [vmem:[%s4180_s22 + $0xe0] sm:$0xff] }
  0x2b   : > { %1319 = vadd.xlane.f32.xlu0 %v1318_v32  ;;  %v1286_v32 = vmul.f32 %v933_v30, %v933_v30 }
  0x2c   : > { %3408 = vmatmul.mubr.msk.f32.gmra.mrb[6].mxu1 %vm293_vm0, %v910_v31  ;;  %1322 = vadd.xlane.f32.xlu1 %v1321_v34  ;;  %v1357_v34 = vsel %vm293_vm0, %v1279_v29, 0.0 }
  0x2d   : > { %3410 = vmatprep.mubr.msk.f32.mxu1 %vm293_vm0, %v911_v11  ;;  %v925_v11 = vld [vmem:[%s4077_s13 + $0xb0] sm:$0xff] }
  0x2e   : > { %v1278_v27 = vmul.f32 %v925_v11, %v925_v11 }
  0x2f   : > { %1301 = vadd.xlane.f32.xlu0 %v1300_v37  ;;  %v1381_v37 = vsel %vm293_vm0, %v1287_v35, 0.0 }
  0x30   : > { %3411 = vmatmul.mubr.msk.f32.gmra.mrb[8].mxu1 %vm293_vm0, %v912_v12  ;;  %1304 = vadd.xlane.f32.xlu1 %v1303_v40  ;;  %v930_v12 = vld [vmem:[%s4077_s13 + $0xd8] sm:$0xff]  ;;  %v1354_v31 = vsel %vm293_vm0, %v1278_v27, 0.0  ;;  %v4193_v40 = vld [vmem:[%s4180_s22 + $0x10] sm:$0xff] }
  0x31   : > { %3413 = vmatprep.mubr.msk.f32.mxu1 %vm293_vm0, %v913_v23  ;;  %v1283_v14 = vmul.f32 %v930_v12, %v930_v12  ;;  %v932_v23 = vld [vmem:[%s4077_s13 + $0xe8] sm:$0xff]  ;;  %v4367_v27 = vld [vmem:[%s4180_s22 + $0xf8] sm:$0xff] }
  0x32   : > { %v1285_v25 = vmul.f32 %v932_v23, %v932_v23  ;;  %5079 = vst [vmem:[#allocation7_spill] sm:$0xff] %v4367_v27 }
  0x33   : > { %1325 = vadd.xlane.f32.xlu0 %v1324_v42  ;;  %v1369_v18 = vsel %vm293_vm0, %v1283_v14, 0.0  ;;  %v4203_v42 = vld [vmem:[%s4180_s22 + $0x20] sm:$0xff]  ;;  %v4321_v14 = vld [vmem:[%s4180_s22 + $0xb8] sm:$0xff] }
  0x34   : > { %3414 = vmatmul.mubr.msk.f32.gmra.mrb[10].mxu1 %vm293_vm0, %v914_v28  ;;  %1328 = vadd.xlane.f32.xlu1 %v1327_v44  ;;  %v1375_v28 = vsel %vm293_vm0, %v1285_v25, 0.0  ;;  %v4213_v44 = vld [vmem:[%s4180_s22 + $0x30] sm:$0xff]  ;;  %5077 = vst [vmem:[#allocation5_spill] sm:$0xff] %v4321_v14 }
  0x35   : > { %3416 = vmatprep.mubr.msk.f32.mxu1 %vm293_vm0, %v915_v36  ;;  %v1378_v36 = vsel %vm293_vm0, %v1286_v32, 0.0  ;;  %v4358_v25 = vld [vmem:[%s4180_s22 + $0xf0] sm:$0xff] }
  0x37   : > { %1307 = vadd.xlane.f32.xlu0 %v1306_v47  ;;  %v4230_v47 = vld [vmem:[%s4180_s22 + $0x40] sm:$0xff] }
  0x38   : > { %3417 = vmatmul.mubr.msk.f32.gmra.mrb[12].mxu1 %vm293_vm0, %v916_v39  ;;  %1310 = vadd.xlane.f32.xlu1 %v1309_v50  ;;  %v4188_v39 = vld [vmem:[%s4180_s22 + $0x8] sm:$0xff] }
  0x39   : > { %3419 = vmatprep.mubr.msk.f32.mxu1 %vm293_vm0, %v917_v46  ;;  %3343 = vmatmul.mubr.msk.f32.vlgmr.msra.gmra.mrb[0].mxu0 %vm293_vm0, %v4188_v39  ;;  %v3703_v46 = vld [vmem:[%s4226_s29] sm:$0xff]   ;;  %v3704_v50 = vld [vmem:[%s4226_s29 + $0x8] sm:$0xff]  }
  0x3a   : > { %3345 = vmatprep.mubr.msk.f32.mxu0 %vm293_vm0, %v4193_v40  ;;  %3446 = vmatprep.subr.bf16.mxu0 %v3703_v46 }
  0x3b   : > { %1331 = vadd.xlane.f32.xlu0 %v1330_v53  ;;  %3447 = vmatpush3.bf16.msra.mxu0 %v3703_v46  ;;  %v4250_v53 = vld [vmem:[%s4180_s22 + $0x58] sm:$0xff] }
  0x3c   : > { %3420 = vmatmul.mubr.msk.f32.gmra.mrb[14].mxu1 %vm293_vm0, %v918_v49  ;;  %1334 = vadd.xlane.f32.xlu1 %v1333_v56  ;;  %v3706_v56 = vld [vmem:[%s4226_s29 + $0x10] sm:$0xff]  }
  0x3d   : > { %3422 = vmatprep.mubr.msk.f32.mxu1 %vm293_vm0, %v919_v52  ;;  %3346 = vmatmul.mubr.msk.f32.gmra.mrb[2].mxu0 %vm293_vm0, %v4198_v41  ;;  %v4245_v52 = vld [vmem:[%s4180_s22 + $0x50] sm:$0xff] }
  0x3e   : > { %3348 = vmatprep.mubr.msk.f32.mxu0 %vm293_vm0, %v4203_v42  ;;  %3448 = vmatprep.subr.bf16.mxu0 %v3704_v50 }
  0x3f   : > { %1337 = vadd.xlane.f32.xlu0 %v1336_v59  ;;  %3449 = vmatpush3.bf16.msra.mxu0 %v3704_v50  ;;  %v3707_v59 = vld [vmem:[%s4226_s29 + $0x28] sm:$0xff]  }
  0x40   : > { %3423 = vmatmul.mubr.msk.f32.gmra.mrb[16].mxu1 %vm293_vm0, %v920_v55  ;;  %1340 = vadd.xlane.f32.xlu1 %v1339_v63  ;;  %v4254_v55 = vld [vmem:[%s4180_s22 + $0x60] sm:$0xff]  ;;  %v4276_v63 = vld [vmem:[%s4180_s22 + $0x78] sm:$0xff] }
  0x41   : > { %3425 = vmatprep.mubr.msk.f32.mxu1 %vm293_vm0, %v921_v61  ;;  %3349 = vmatmul.mubr.msk.f32.gmra.mrb[4].mxu0 %vm293_vm0, %v4208_v43  ;;  %v4268_v61 = vld [vmem:[%s4180_s22 + $0x70] sm:$0xff] }
  0x42   : > { %3351 = vmatprep.mubr.msk.f32.mxu0 %vm293_vm0, %v4213_v44  ;;  %3450 = vmatprep.subr.bf16.mxu0 %v3706_v56 }
  0x43   : > { %1361 = vadd.xlane.f32.xlu0 %v1360_v2  ;;  %3451 = vmatpush3.bf16.msra.mxu0 %v3706_v56  ;;  %v3709_v2 = vld [vmem:[%s4226_s29 + $0x30] sm:$0xff]  }
  0x44   : > { %3426 = vmatmul.mubr.msk.f32.gmra.mrb[18].mxu1 %vm293_vm0, %v922_v1  ;;  %1364 = vadd.xlane.f32.xlu1 %v1363_v5  ;;  %v4279_v1 = vld [vmem:[%s4180_s22 + $0x80] sm:$0xff]  ;;  %v4290_v5 = vld [vmem:[%s4180_s22 + $0x90] sm:$0xff] }
  0x45   : > { %3428 = vmatprep.mubr.msk.f32.mxu1 %vm293_vm0, %v923_v4  ;;  %3352 = vmatmul.mubr.msk.f32.gmra.mrb[6].mxu0 %vm293_vm0, %v4218_v45  ;;  %v4285_v4 = vld [vmem:[%s4180_s22 + $0x88] sm:$0xff] }
  0x46   : > { %3354 = vmatprep.mubr.msk.f32.mxu0 %vm293_vm0, %v4230_v47  ;;  %3472 = vmatprep.subr.bf16.mxu1 %v3707_v59 }
  0x47   : > { %1343 = vadd.xlane.f32.xlu0 %v1342_v9  ;;  %3473 = vmatpush3.bf16.msra.mxu1 %v3707_v59  ;;  %v4304_v9 = vld [vmem:[%s4180_s22 + $0xa0] sm:$0xff]  ;;  %v256_v59 = vlaneseq }
  0x48   : > { %3429 = vmatmul.mubr.msk.f32.gmra.mrb[20].mxu1 %vm293_vm0, %v924_v8  ;;  %1346 = vadd.xlane.f32.xlu1 %v1345_v13 }
  0x49   : > { %3431 = vmatprep.mubr.msk.f32.mxu1 %vm293_vm0, %v925_v11  ;;  %3355 = vmatmul.mubr.msk.f32.gmra.mrb[8].mxu0 %vm293_vm0, %v4233_v48 }
  0x4a   : > { %3357 = vmatprep.mubr.msk.f32.mxu0 %vm293_vm0, %v4245_v52  ;;  %3474 = vmatprep.subr.bf16.mxu1 %v3709_v2 }
  0x4b   : > { %1367 = vadd.xlane.f32.xlu0 %v1366_v16  ;;  %3475 = vmatpush3.bf16.msra.mxu1 %v3709_v2  ;;  %v3710_v2 = vld [vmem:[%s4226_s29 + $0x38] sm:$0xff]  }
  0x4c   : > { %3432 = vmatmul.mubr.msk.f32.gmra.mrb[22].mxu1 %vm293_vm0, %v926_v15  ;;  %1370 = vadd.xlane.f32.xlu1 %v1369_v18  ;;  %v4324_v15 = vld [vmem:[%s4180_s22 + $0xc0] sm:$0xff] }
  0x4d   : > { %3434 = vmatprep.mubr.msk.f32.mxu1 %vm293_vm0, %v927_v58  ;;  %3358 = vmatmul.mubr.msk.f32.gmra.mrb[10].mxu0 %vm293_vm0, %v4250_v53  ;;  %v4264_v58 = vld [vmem:[%s4180_s22 + $0x68] sm:$0xff] }
  0x4e   : > { %3360 = vmatprep.mubr.msk.f32.mxu0 %vm293_vm0, %v4254_v55  ;;  %3476 = vmatprep.subr.bf16.mxu1 %v3710_v2 }
  0x4f   : > { %1349 = vadd.xlane.f32.xlu0 %v1348_v21  ;;  %3477 = vmatpush3.bf16.msra.mxu1 %v3710_v2 }
  0x50   : > { %3435 = vmatmul.mubr.msk.f32.gmra.mrb[24].mxu1 %vm293_vm0, %v928_v62  ;;  %1352 = vadd.xlane.f32.xlu1 %v1351_v24  ;;  %v3708_v62 = vld [vmem:[%s4226_s29 + $0x18] sm:$0xff]   ;;  %v4355_v24 = vld [vmem:[%s4180_s22 + $0xe8] sm:$0xff] }
  0x51   : > { %3437 = vmatprep.mubr.msk.f32.mxu1 %vm293_vm0, %v929_v7  ;;  %3361 = vmatmul.mubr.msk.f32.gmra.mrb[12].mxu0 %vm293_vm0, %v4264_v58  ;;  %v4299_v7 = vld [vmem:[%s4180_s22 + $0x98] sm:$0xff]  ;;  %5078 = vst [vmem:[#allocation6_spill] sm:$0xff] %v4355_v24 }
  0x52   : > { %3363 = vmatprep.mubr.msk.f32.mxu0 %vm293_vm0, %v4268_v61  ;;  %3452 = vmatprep.subr.bf16.mxu0 %v3708_v62 }
  0x53   : > { %1373 = vadd.xlane.f32.xlu0 %v1372_v26  ;;  %3453 = vmatpush3.bf16.msra.mxu0 %v3708_v62 }
  0x54   : > { %3438 = vmatmul.mubr.msk.f32.gmra.mrb[26].mxu1 %vm293_vm0, %v930_v12  ;;  %1376 = vadd.xlane.f32.xlu1 %v1375_v28  ;;  %v4314_v12 = vld [vmem:[%s4180_s22 + $0xb0] sm:$0xff] }
  0x55   : > { %3440 = vmatprep.mubr.msk.f32.mxu1 %vm293_vm0, %v931_v20  ;;  %3364 = vmatmul.mubr.msk.f32.gmra.mrb[14].mxu0 %vm293_vm0, %v4276_v63  ;;  %v4345_v20 = vld [vmem:[%s4180_s22 + $0xd8] sm:$0xff]  ;;  %s3980_s22 = smov [#allocation2]  }
  0x56   : > { %3366 = vmatprep.mubr.msk.f32.mxu0 %vm293_vm0, %v4279_v1  ;;  %s3915_s23 = sshll.u32 %s3980_s22, 4  ;;  %s3916_s23 = int_to_ptr.vmem [resolvable:$false] %s3915_s23 }
  0x57   : > { %1355 = vadd.xlane.f32.xlu0 %v1354_v31  ;;  %s3917_s27 = scalar_lea.vmem %s3916_s23, 2048  ;;  %p3918_p0 = scmp.lt.s32.totalorder %s5019_s11, %s3916_s23 }
  0x58   : > { %3441 = vmatmul.mubr.msk.f32.gmra.mrb[28].mxu1 %vm293_vm0, %v932_v23  ;;  %1358 = vadd.xlane.f32.xlu1 %v1357_v34  ;;  %p3919_p1 = scmp.lt.s32.totalorder %s3917_s27, %s3911_s20 }
  0x59   : > { %3443 = vmatprep.mubr.msk.f32.mxu1 %vm293_vm0, %v933_v30  ;;  %3367 = vmatmul.mubr.msk.f32.gmra.mrb[16].mxu0 %vm293_vm0, %v4285_v4 }
  0x5a   : > { %3369 = vmatprep.mubr.msk.f32.mxu0 %vm293_vm0, %v4290_v5  ;;  %p3920_p2 = por %p3919_p1, %p3918_p0 }
  0x5b   : > { %1379 = vadd.xlane.f32.xlu0 %v1378_v36 }
  0x5c   : > { %3444 = vmatmul.mubr.msk.f32.gmra.mrb[30].mxu1 %vm293_vm0, %v934_v33  ;;  %1382 = vadd.xlane.f32.xlu1 %v1381_v37  ;;  %p3921_p3 = pnand %p3920_p2, %p3914_p13 }
  0x5d   : > { %3370 = vmatmul.mubr.msk.f32.gmra.mrb[18].mxu0 %vm293_vm0, %v4299_v7 }
  0x5e   : > { %3372 = vmatprep.mubr.msk.f32.mxu0 %vm293_vm0, %v4304_v9 }
  0x61   : > { %3373 = vmatmul.mubr.msk.f32.gmra.mrb[20].mxu0 %vm293_vm0, %v4311_v10 }
  0x62   : > { %3375 = vmatprep.mubr.msk.f32.mxu0 %vm293_vm0, %v4314_v12 }
  0x65   : > { %3376 = vmatmul.mubr.msk.f32.gmra.mrb[22].mxu0 %vm293_vm0, %v4321_v14 }
  0x66   : > { %3378 = vmatprep.mubr.msk.f32.mxu0 %vm293_vm0, %v4324_v15 }
  0x69   : > { %3379 = vmatmul.mubr.msk.f32.gmra.mrb[24].mxu0 %vm293_vm0, %v4333_v17 }
  0x6a   : > { %3381 = vmatprep.mubr.msk.f32.mxu0 %vm293_vm0, %v4338_v19 }
  0x6d   : > { %3382 = vmatmul.mubr.msk.f32.gmra.mrb[26].mxu0 %vm293_vm0, %v4345_v20 }
  0x6e   : > { %3384 = vmatprep.mubr.msk.f32.mxu0 %vm293_vm0, %v4348_v22 }
  0x71   : > { %3385 = vmatmul.mubr.msk.f32.gmra.mrb[28].mxu0 %vm293_vm0, %v4355_v24 }
  0x72   : > { %3387 = vmatprep.mubr.msk.f32.mxu0 %vm293_vm0, %v4358_v25 }
  0x75   : > { %3388 = vmatmul.mubr.msk.f32.gmra.mrb[30].mxu0 %vm293_vm0, %v4367_v27 }
  0xac   : > { %v4240_v51 = vpop.xlane.xlu0 %1289 }
  0xad   : > { %v4235_v49 = vpop.xlane.xlu1 %1313  ;;  %v1384_v30 = vmul.f32 0.5, %v4240_v51 }
  0xb0   : > { %v1293_v60 = vpop.xlane.xlu0 %1292 }
  0xb1   : > { %v4257_v57 = vpop.xlane.xlu1 %1316  ;;  %v1385_v29 = vmul.f32 0.5, %v1293_v60 }
  0xb2   : > { %v1393_v2 = vmul.f32 0.5, %v4257_v57 }
  0xb4   : > { %v1296_v3 = vpop.xlane.xlu0 %1295 }
  0xb5   : > { %v1299_v0 = vpop.xlane.xlu1 %1298  ;;  %v1386_v50 = vmul.f32 0.5, %v1296_v3 }
  0xb6   : > { %v1387_v36 = vmul.f32 0.5, %v1299_v0 }
  0xb8   : > { %v4301_v8 = vpop.xlane.xlu0 %1319 }
  0xb9   : > { %v4292_v6 = vpop.xlane.xlu1 %1322 }
  0xbc   : > { %v1302_v13 = vpop.xlane.xlu0 %1301 }
  0xbd   : > { %v1305_v11 = vpop.xlane.xlu1 %1304 }
  0xc0   : > { %v4335_v18 = vpop.xlane.xlu0 %1325 }
  0xc1   : > { %v4326_v16 = vpop.xlane.xlu1 %1328  ;;  %v1396_v14 = vmul.f32 0.5, %v4335_v18 }
  0xc4   : > { %v1308_v23 = vpop.xlane.xlu0 %1307 }
  0xc5   : > { %v1311_v21 = vpop.xlane.xlu1 %1310 }
  0xc6   : > { %v1391_v24 = vmul.f32 0.5, %v1311_v21 }
  0xc8   : > { %v4369_v28 = vpop.xlane.xlu0 %1331 }
  0xc9   : > { %v4360_v26 = vpop.xlane.xlu1 %1334 }
  0xcc   : > { %v4376_v46 = vpop.xlane.xlu0 %1337 }
  0xcd   : > { %v4374_v34 = vpop.xlane.xlu1 %1340 }
  0xd1   : > { %v4379_v27 = vpop.xlane.xlu1 %1364 }
  0xf3   : > { %v3400_v31 = vpop.f32.mrb[0].mxu1 }
  0xf4   : > { %v1417_v32 = vsub.f32 %v3400_v31, %v1385_v29  ;;  %v1097_v33 = vpop.f32.mrb[1].mxu1  ;;  %v1389_v29 = vmul.f32 0.5, %v1305_v11  ;;  %v4384_v11 = vld [vmem:[%s4226_s29 + $0x40] sm:$0xff]  }
  0xf5   : > { %v1416_v35 = vsub.f32 %v1097_v33, %v1384_v30  ;;  %v1388_v30 = vmul.f32 0.5, %v1302_v13  ;;  %v257_v33 = vand.u32 127, %v256_v59  ;;  %3494 = vmatprep.subr.bf16.mxu0 %v4384_v11 }
  0xf6   : > { %v1450_v37 = vmul.f32 1.442695, %v1417_v32 }
  0xf7   : > { %v1448_v54 = vmul.f32 1.442695, %v1416_v35  ;;  %v3403_v56 = vpop.f32.mrb[2].mxu1  ;;  %vm258_vm1 = vcmp.lt.s32.totalorder %v257_v33, 110 }
  0xf8   : > { %3719 = vpow2.f32 %v1450_v37  ;;  %v1419_v60 = vsub.f32 %v3403_v56, %v1387_v36  ;;  %v1107_v62 = vpop.f32.mrb[3].mxu1  ;;  %v4381_v37 = vpop.xlane.xlu0 %1361 }
  0xf9   : > { %3721 = vpow2.f32 %v1448_v54  ;;  %v1418_v51 = vsub.f32 %v1107_v62, %v1386_v50  ;;  %v1390_v50 = vmul.f32 0.5, %v1308_v23  ;;  %v4387_v62 = vpop.xlane.xlu1 %1346  ;;  %v3975_v23 = vmov 0.0  }
  0xfa   : > { %v1454_v31 = vmul.f32 1.442695, %v1419_v60 }
  0xfb   : > { %v1452_v0 = vmul.f32 1.442695, %v1418_v51  ;;  %v3406_v32 = vpop.f32.mrb[4].mxu1 }
  0xfc   : > { %3723 = vpow2.f32 %v1454_v31  ;;  %v1421_v3 = vsub.f32 %v3406_v32, %v1389_v29  ;;  %v1117_v35 = vpop.f32.mrb[5].mxu1  ;;  %v4390_v31 = vsel %vm258_vm1, 1.0, %v3975_v23  ;;  %v1392_v32 = vmul.f32 0.5, %v4235_v49 }
  0xfd   : > { %3725 = vpow2.f32 %v1452_v0  ;;  %v1420_v36 = vsub.f32 %v1117_v35, %v1388_v30  ;;  %v4392_v30 = vpop.xlane.xlu0 %1343  ;;  %v4398_v23 = vpop.xlane.xlu1 %1370 }
  0xfe   : > { %v1458_v54 = vmul.f32 1.442695, %v1421_v3 }
  0xff   : > { %v1456_v56 = vmul.f32 1.442695, %v1420_v36  ;;  %v3409_v60 = vpop.f32.mrb[6].mxu1 }
 0x100   : > { %3727 = vpow2.f32 %v1458_v54  ;;  %v1423_v13 = vsub.f32 %v3409_v60, %v1391_v24  ;;  %v1127_v59 = vpop.f32.mrb[7].mxu1  ;;  %v1395_v60 = vmul.f32 0.5, %v4292_v6 }
 0x101   : > { %3729 = vpow2.f32 %v1456_v56  ;;  %v1422_v21 = vsub.f32 %v1127_v59, %v1390_v50 }
 0x102   : > { %v3720_v51 = vpop.eup %3719  ;;  %v1462_v29 = vmul.f32 1.442695, %v1423_v13 }
 0x103   : > { %v3722_v0 = vpop.eup %3721  ;;  %v1513_v33 = vadd.f32 0.0001, %v3720_v51  ;;  %v1460_v3 = vmul.f32 1.442695, %v1422_v21  ;;  %v3412_v24 = vpop.f32.mrb[8].mxu1  ;;  %v1394_v21 = vmul.f32 0.5, %v4301_v8 }
 0x104   : > { %v1512_v35 = vadd.f32 0.0001, %v3722_v0  ;;  %3731 = vpow2.f32 %v1462_v29  ;;  %v1425_v36 = vsub.f32 %v3412_v24, %v1393_v2  ;;  %v1137_v54 = vpop.f32.mrb[9].mxu1 }
 0x105   : > { %3733 = vpow2.f32 %v1460_v3  ;;  %v1424_v50 = vsub.f32 %v1137_v54, %v1392_v32  ;;  %v1545_v57 = vmul.f32 %v4390_v31, %v1513_v33  ;;  %v4401_v33 = vpop.xlane.xlu0 %1367  ;;  %v1397_v54 = vmul.f32 0.5, %v4326_v16 }
 0x106   : > { %v3724_v56 = vpop.eup %3723  ;;  %v1466_v13 = vmul.f32 1.442695, %v1425_v36  ;;  %v1544_v59 = vmul.f32 %v4390_v31, %v1512_v35 }
 0x107   : > { %v3726_v49 = vpop.eup %3725  ;;  %v1515_v51 = vadd.f32 0.0001, %v3724_v56  ;;  %v1464_v0 = vmul.f32 1.442695, %v1424_v50  ;;  %v3415_v29 = vpop.f32.mrb[10].mxu1 }
 0x108   : > { %v1514_v2 = vadd.f32 0.0001, %v3726_v49  ;;  %3735 = vpow2.f32 %v1466_v13  ;;  %v1427_v3 = vsub.f32 %v3415_v29, %v1395_v60  ;;  %v1147_v32 = vpop.f32.mrb[11].mxu1  ;;  %v1608_v24 = vpack.c.bf16 %v1545_v57, %v1544_v59  ;;  %v1353_v29 = vpop.xlane.xlu1 %1352 }
 0x109   : > { %3737 = vpow2.f32 %v1464_v0  ;;  %v1426_v6 = vsub.f32 %v1147_v32, %v1394_v21  ;;  %v1547_v36 = vmul.f32 %v4390_v31, %v1515_v51  ;;  %v1399_v57 = vmul.f32 0.5, %v4360_v26 }
 0x10a   : > { %v3728_v35 = vpop.eup %3727  ;;  %v1470_v8 = vmul.f32 1.442695, %v1427_v3  ;;  %1624 = vxpose.xlu0.c.b16.start [1/4] (short) %v1608_v24, 128  ;;  %v1546_v50 = vmul.f32 %v4390_v31, %v1514_v2  ;;  %v4410_v3 = vld [vmem:[%s4226_s29 + $0x60] sm:$0xff]   ;;  %v1398_v2 = vmul.f32 0.5, %v4369_v28 }
 0x10b   : > { %v3730_v56 = vpop.eup %3729  ;;  %v1517_v60 = vadd.f32 0.0001, %v3728_v35  ;;  %v1468_v13 = vmul.f32 1.442695, %v1426_v6  ;;  %v3418_v59 = vpop.f32.mrb[12].mxu1  ;;  %3518 = vmatprep.subr.bf16.mxu1 %v4410_v3 }
 0x10c   : > { %v1516_v49 = vadd.f32 0.0001, %v3730_v56  ;;  %3739 = vpow2.f32 %v1470_v8  ;;  %v1429_v21 = vsub.f32 %v3418_v59, %v1397_v54  ;;  %v1157_v51 = vpop.f32.mrb[13].mxu1  ;;  %v1609_v0 = vpack.c.bf16 %v1547_v36, %v1546_v50  ;;  %v1350_v6 = vpop.xlane.xlu0 %1349 }
 0x10d   : > { %3741 = vpow2.f32 %v1468_v13  ;;  %v1428_v16 = vsub.f32 %v1157_v51, %v1396_v14  ;;  %v1549_v18 = vmul.f32 %v4390_v31, %v1517_v60  ;;  %v1401_v54 = vmul.f32 0.5, %v4374_v34 }
 0x10e   : > { %v3732_v32 = vpop.eup %3731  ;;  %v1474_v24 = vmul.f32 1.442695, %v1429_v21  ;;  %1625 = vxpose.xlu0.c.b16.cont [2/4] (short) %v1609_v0, 128  ;;  %v1548_v26 = vmul.f32 %v4390_v31, %v1516_v49  ;;  %v1400_v49 = vmul.f32 0.5, %v4376_v46  ;;  %v4419_v0 = vpop.xlane.xlu1 %1376  ;;  %v1402_v46 = vmul.f32 0.5, %v4392_v30 }
 0x10f   : > { %v3734_v35 = vpop.eup %3733  ;;  %v1519_v8 = vadd.f32 0.0001, %v3732_v32  ;;  %v1472_v36 = vmul.f32 1.442695, %v1428_v16  ;;  %v3421_v50 = vpop.f32.mrb[14].mxu1 }
 0x110   : > { %v1518_v14 = vadd.f32 0.0001, %v3734_v35  ;;  %3743 = vpow2.f32 %v1474_v24  ;;  %v1431_v56 = vsub.f32 %v3421_v50, %v1399_v57  ;;  %v1167_v60 = vpop.f32.mrb[15].mxu1  ;;  %v1610_v13 = vpack.c.bf16 %v1549_v18, %v1548_v26 }
 0x111   : > { %3745 = vpow2.f32 %v1472_v36  ;;  %v1430_v28 = vsub.f32 %v1167_v60, %v1398_v2  ;;  %v1551_v59 = vmul.f32 %v4390_v31, %v1519_v8  ;;  %v1403_v24 = vmul.f32 0.5, %v4387_v62  ;;  %v4422_v36 = vpop.xlane.xlu0 %1373 }
 0x112   : > { %v3736_v21 = vpop.eup %3735  ;;  %v1478_v51 = vmul.f32 1.442695, %v1431_v56  ;;  %1626 = vxpose.xlu0.c.b16.cont [3/4] (short) %v1610_v13, 128  ;;  %v1550_v34 = vmul.f32 %v4390_v31, %v1518_v14  ;;  %v1359_v30 = vpop.xlane.xlu1 %1358 }
 0x113   : > { %v3738_v16 = vpop.eup %3737  ;;  %v1521_v32 = vadd.f32 0.0001, %v3736_v21  ;;  %v1476_v57 = vmul.f32 1.442695, %v1430_v28  ;;  %v3424_v35 = vpop.f32.mrb[16].mxu1 }
 0x114   : > { %v1520_v18 = vadd.f32 0.0001, %v3738_v16  ;;  %3747 = vpow2.f32 %v1478_v51  ;;  %v1433_v2 = vsub.f32 %v3424_v35, %v1401_v54  ;;  %v1177_v26 = vpop.f32.mrb[17].mxu1  ;;  %v1611_v8 = vpack.c.bf16 %v1551_v59, %v1550_v34 }
 0x115   : > { %3749 = vpow2.f32 %v1476_v57  ;;  %v1432_v50 = vsub.f32 %v1177_v26, %v1400_v49  ;;  %v1553_v14 = vmul.f32 %v4390_v31, %v1521_v32  ;;  %v1405_v51 = vmul.f32 0.5, %v1353_v29 }
 0x116   : > { %v3740_v56 = vpop.eup %3739  ;;  %v1482_v60 = vmul.f32 1.442695, %v1433_v2  ;;  %1627 = vxpose.xlu0.c.b16.end [4/4] (short) %v1611_v8, 128  ;;  %v1552_v62 = vmul.f32 %v4390_v31, %v1520_v18  ;;  %v1404_v49 = vmul.f32 0.5, %v1350_v6  ;;  %v1356_v18 = vpop.xlane.xlu0 %1355 }
 0x117   : > { %v3742_v13 = vpop.eup %3741  ;;  %v1523_v28 = vadd.f32 0.0001, %v3740_v56  ;;  %v1480_v21 = vmul.f32 1.442695, %v1432_v50  ;;  %v3427_v54 = vpop.f32.mrb[18].mxu1 }
 0x118   : > { %v1522_v16 = vadd.f32 0.0001, %v3742_v13  ;;  %3751 = vpow2.f32 %v1482_v60  ;;  %v1435_v59 = vsub.f32 %v3427_v54, %v1403_v24  ;;  %v1187_v34 = vpop.f32.mrb[19].mxu1  ;;  %v1612_v35 = vpack.c.bf16 %v1553_v14, %v1552_v62 }
 0x119   : > { %3753 = vpow2.f32 %v1480_v21  ;;  %v1434_v57 = vsub.f32 %v1187_v34, %v1402_v46  ;;  %v1555_v32 = vmul.f32 %v4390_v31, %v1523_v28  ;;  %v1407_v60 = vmul.f32 0.5, %v1359_v30 }
 0x11a   : > { %v3744_v2 = vpop.eup %3743  ;;  %v1486_v26 = vmul.f32 1.442695, %v1435_v59  ;;  %1786 = vxpose.xlu1.c.b16.start [1/4] (short) %v1612_v35, 128  ;;  %v1554_v8 = vmul.f32 %v4390_v31, %v1522_v16  ;;  %v1406_v46 = vmul.f32 0.5, %v1356_v18 }
 0x11b   : > { %v3746_v50 = vpop.eup %3745  ;;  %v1525_v29 = vadd.f32 0.0001, %v3744_v2  ;;  %v1484_v56 = vmul.f32 1.442695, %v1434_v57  ;;  %v3430_v13 = vpop.f32.mrb[20].mxu1 }
 0x11c   : > { %v1524_v24 = vadd.f32 0.0001, %v3746_v50  ;;  %3755 = vpow2.f32 %v1486_v26  ;;  %v1437_v14 = vsub.f32 %v3430_v13, %v1405_v51  ;;  %v1197_v62 = vpop.f32.mrb[21].mxu1  ;;  %v1613_v21 = vpack.c.bf16 %v1555_v32, %v1554_v8 }
 0x11d   : > { %3757 = vpow2.f32 %v1484_v56  ;;  %v1436_v6 = vsub.f32 %v1197_v62, %v1404_v49  ;;  %v1557_v28 = vmul.f32 %v4390_v31, %v1525_v29  ;;  %v1409_v8 = vmul.f32 0.5, %v4379_v27 }
 0x11e   : > { %v3748_v54 = vpop.eup %3747  ;;  %v1490_v59 = vmul.f32 1.442695, %v1437_v14  ;;  %1787 = vxpose.xlu1.c.b16.cont [2/4] (short) %v1613_v21, 128  ;;  %v1556_v16 = vmul.f32 %v4390_v31, %v1524_v24  ;;  %v1408_v24 = vmul.f32 0.5, %v4381_v37 }
 0x11f   : > { %v3750_v34 = vpop.eup %3749  ;;  %v1527_v35 = vadd.f32 0.0001, %v3748_v54  ;;  %v1488_v57 = vmul.f32 1.442695, %v1436_v6  ;;  %v3433_v2 = vpop.f32.mrb[22].mxu1 }
 0x120   : > { %v1526_v30 = vadd.f32 0.0001, %v3750_v34  ;;  %3759 = vpow2.f32 %v1490_v59  ;;  %v1439_v26 = vsub.f32 %v3433_v2, %v1407_v60  ;;  %v1207_v51 = vpop.f32.mrb[23].mxu1  ;;  %v1614_v50 = vpack.c.bf16 %v1557_v28, %v1556_v16 }
 0x121   : > { %3761 = vpow2.f32 %v1488_v57  ;;  %v1438_v32 = vsub.f32 %v1207_v51, %v1406_v46  ;;  %v1559_v49 = vmul.f32 %v4390_v31, %v1527_v35  ;;  %v1411_v16 = vmul.f32 0.5, %v4398_v23 }
 0x122   : > { %v3752_v18 = vpop.eup %3751  ;;  %v1494_v29 = vmul.f32 1.442695, %v1439_v26  ;;  %1788 = vxpose.xlu1.c.b16.cont [3/4] (short) %v1614_v50, 128  ;;  %v1558_v56 = vmul.f32 %v4390_v31, %v1526_v30  ;;  %v1410_v57 = vmul.f32 0.5, %v4401_v33  ;;  %v1380_v33 = vpop.xlane.xlu0 %1379 }
 0x123   : > { %v3754_v13 = vpop.eup %3753  ;;  %v1529_v14 = vadd.f32 0.0001, %v3752_v18  ;;  %v1492_v62 = vmul.f32 1.442695, %v1438_v32  ;;  %v3436_v21 = vpop.f32.mrb[24].mxu1 }
 0x124   : > { %v1528_v60 = vadd.f32 0.0001, %v3754_v13  ;;  %3763 = vpow2.f32 %v1494_v29  ;;  %v1441_v6 = vsub.f32 %v3436_v21, %v1409_v8  ;;  %v1217_v28 = vpop.f32.mrb[25].mxu1  ;;  %v1615_v46 = vpack.c.bf16 %v1559_v49, %v1558_v56  ;;  %v1383_v18 = vpop.xlane.xlu1 %1382 }
 0x125   : > { %3765 = vpow2.f32 %v1492_v62  ;;  %v1440_v54 = vsub.f32 %v1217_v28, %v1408_v24  ;;  %v1561_v59 = vmul.f32 %v4390_v31, %v1529_v14  ;;  %v1413_v56 = vmul.f32 0.5, %v4419_v0 }
 0x126   : > { %v3756_v27 = vpop.eup %3755  ;;  %v1498_v34 = vmul.f32 1.442695, %v1441_v6  ;;  %1789 = vxpose.xlu1.c.b16.end [4/4] (short) %v1615_v46, 128  ;;  %v1560_v35 = vmul.f32 %v4390_v31, %v1528_v60  ;;  %v1412_v13 = vmul.f32 0.5, %v4422_v36  ;;  %v1415_v28 = vmul.f32 0.5, %v1383_v18 }
 0x127   : > { %v3758_v37 = vpop.eup %3757  ;;  %v1531_v2 = vadd.f32 0.0001, %v3756_v27  ;;  %v1496_v30 = vmul.f32 1.442695, %v1440_v54  ;;  %v3439_v26 = vpop.f32.mrb[26].mxu1  ;;  %v1414_v0 = vmul.f32 0.5, %v1380_v33 }
 0x128   : > { %v1530_v51 = vadd.f32 0.0001, %v3758_v37  ;;  %3767 = vpow2.f32 %v1498_v34  ;;  %v1443_v50 = vsub.f32 %v3439_v26, %v1411_v16  ;;  %v1227_v32 = vpop.f32.mrb[27].mxu1  ;;  %v1616_v49 = vpack.c.bf16 %v1561_v59, %v1560_v35 }
 0x129   : > { %3769 = vpow2.f32 %v1496_v30  ;;  %v1442_v8 = vsub.f32 %v1227_v32, %v1410_v57  ;;  %v1563_v23 = vmul.f32 %v4390_v31, %v1531_v2 }
 0x12a   : > { %v3760_v29 = vpop.eup %3759  ;;  %v1502_v24 = vmul.f32 1.442695, %v1443_v50  ;;  %1947 = vxpose.xlu0.c.b16.start [1/4] (short) %v1616_v49, 128  ;;  %v1562_v14 = vmul.f32 %v4390_v31, %v1530_v51 }
 0x12b   : > { %v3762_v62 = vpop.eup %3761  ;;  %v1533_v21 = vadd.f32 0.0001, %v3760_v29  ;;  %v1500_v60 = vmul.f32 1.442695, %v1442_v8  ;;  %v3442_v6 = vpop.f32.mrb[28].mxu1 }
 0x12c   : > { %v1532_v46 = vadd.f32 0.0001, %v3762_v62  ;;  %3771 = vpow2.f32 %v1502_v24  ;;  %v1445_v54 = vsub.f32 %v3442_v6, %v1413_v56  ;;  %v1237_v59 = vpop.f32.mrb[29].mxu1  ;;  %v1617_v27 = vpack.c.bf16 %v1563_v23, %v1562_v14 }
 0x12d   : > { %3773 = vpow2.f32 %v1500_v60  ;;  %v1444_v16 = vsub.f32 %v1237_v59, %v1412_v13  ;;  %v1565_v36 = vmul.f32 %v4390_v31, %v1533_v21 }
 0x12e   : > { %v3764_v34 = vpop.eup %3763  ;;  %v1506_v35 = vmul.f32 1.442695, %v1445_v54  ;;  %1948 = vxpose.xlu0.c.b16.cont [2/4] (short) %v1617_v27, 128  ;;  %v1564_v37 = vmul.f32 %v4390_v31, %v1532_v46 }
 0x12f   : > { %v3766_v57 = vpop.eup %3765  ;;  %v1535_v2 = vadd.f32 0.0001, %v3764_v34  ;;  %v1504_v30 = vmul.f32 1.442695, %v1444_v16  ;;  %v3445_v26 = vpop.f32.mrb[30].mxu1 }
 0x130   : > { %v1534_v51 = vadd.f32 0.0001, %v3766_v57  ;;  %3775 = vpow2.f32 %v1506_v35  ;;  %v1447_v50 = vsub.f32 %v3445_v26, %v1415_v28  ;;  %v1247_v32 = vpop.f32.mrb[31].mxu1  ;;  %v1618_v49 = vpack.c.bf16 %v1565_v36, %v1564_v37 }
 0x131   : > { %3777 = vpow2.f32 %v1504_v30  ;;  %v1446_v18 = vsub.f32 %v1247_v32, %v1414_v0  ;;  %v1567_v8 = vmul.f32 %v4390_v31, %v1535_v2 }
 0x132   : > { %v3768_v23 = vpop.eup %3767  ;;  %v1510_v29 = vmul.f32 1.442695, %v1447_v50  ;;  %1949 = vxpose.xlu0.c.b16.cont [3/4] (short) %v1618_v49, 128  ;;  %v1566_v56 = vmul.f32 %v4390_v31, %v1534_v51 }
 0x133   : > { %v3770_v13 = vpop.eup %3769  ;;  %v1537_v24 = vadd.f32 0.0001, %v3768_v23  ;;  %v1508_v33 = vmul.f32 1.442695, %v1446_v18  ;;  %v615_v23 = vmul.f32 %v4183_v38, %v4183_v38  ;;  %v616_v38 = vmul.f32 %v4188_v39, %v4188_v39 }
 0x134   : > { %v1536_v14 = vadd.f32 0.0001, %v3770_v13  ;;  %3779 = vpow2.f32 %v1510_v29  ;;  %v1619_v62 = vpack.c.bf16 %v1567_v8, %v1566_v56  ;;  %v617_v56 = vmul.f32 %v4193_v40, %v4193_v40 }
 0x135   : > { %3781 = vpow2.f32 %v1508_v33  ;;  %v1569_v21 = vmul.f32 %v4390_v31, %v1537_v24  ;;  %v647_v29 = vsel %vm293_vm0, %v615_v23, 0.0  ;;  %v623_v24 = vmul.f32 %v4230_v47, %v4230_v47 }
 0x136   : > { %v3772_v60 = vpop.eup %3771  ;;  %1950 = vxpose.xlu0.c.b16.end [4/4] (short) %v1619_v62, 128  ;;  %v1568_v6 = vmul.f32 %v4390_v31, %v1536_v14  ;;  %v653_v13 = vsel %vm293_vm0, %v617_v56, 0.0  ;;  %v619_v40 = vmul.f32 %v4203_v42, %v4203_v42  ;;  %v650_v62 = vsel %vm293_vm0, %v616_v38, 0.0 }
 0x137   : > { %v3774_v28 = vpop.eup %3773  ;;  %v1539_v46 = vadd.f32 0.0001, %v3772_v60  ;;  %v671_v33 = vsel %vm293_vm0, %v623_v24, 0.0  ;;  %v618_v47 = vmul.f32 %v4198_v41, %v4198_v41  ;;  %v624_v60 = vmul.f32 %v4233_v48, %v4233_v48  ;;  %v3717_v24 = vld [vmem:[%s4226_s29 + $0x70] sm:$0xff]  }
 0x138   : > { %v1538_v54 = vadd.f32 0.0001, %v3774_v28  ;;  %v1620_v59 = vpack.c.bf16 %v1569_v21, %v1568_v6  ;;  %v659_v21 = vsel %vm293_vm0, %v619_v40, 0.0  ;;  %v627_v6 = vmul.f32 %v4254_v55, %v4254_v55 }
 0x139   : > { %v1571_v27 = vmul.f32 %v4390_v31, %v1539_v46  ;;  %v656_v39 = vsel %vm293_vm0, %v618_v47, 0.0  ;;  %v674_v41 = vsel %vm293_vm0, %v624_v60, 0.0  ;;  %v626_v28 = vmul.f32 %v4250_v53, %v4250_v53 }
 0x13a   : > { %v3776_v16 = vpop.eup %3775  ;;  %2108 = vxpose.xlu1.c.b16.start [1/4] (short) %v1620_v59, 128  ;;  %v1570_v0 = vmul.f32 %v4390_v31, %v1538_v54  ;;  %v629_v46 = vmul.f32 %v4268_v61, %v4268_v61  ;;  %v620_v55 = vmul.f32 %v4208_v43, %v4208_v43  ;;  %v631_v59 = vmul.f32 %v4279_v1, %v4279_v1 }
 0x13b   : > { %v3778_v36 = vpop.eup %3777  ;;  %v1541_v34 = vadd.f32 0.0001, %v3776_v16  ;;  %v680_v48 = vsel %vm293_vm0, %v626_v28, 0.0  ;;  %v622_v61 = vmul.f32 %v4218_v45, %v4218_v45  ;;  %v633_v43 = vmul.f32 %v4290_v5, %v4290_v5  ;;  %v3713_v5 = vld [vmem:[%s4226_s29 + $0x50] sm:$0xff]  }
 0x13c   : > { %v1540_v35 = vadd.f32 0.0001, %v3778_v36  ;;  %v1621_v37 = vpack.c.bf16 %v1571_v27, %v1570_v0  ;;  %v689_v54 = vsel %vm293_vm0, %v629_v46, 0.0  ;;  %v662_v27 = vsel %vm293_vm0, %v620_v55, 0.0  ;;  %v3712_v0 = vld [vmem:[%s4226_s29 + $0x48] sm:$0xff]  }
 0x13d   : > { %v1573_v57 = vmul.f32 %v4390_v31, %v1541_v34  ;;  %v695_v16 = vsel %vm293_vm0, %v631_v59, 0.0  ;;  %v668_v36 = vsel %vm293_vm0, %v622_v61, 0.0  ;;  %v628_v34 = vmul.f32 %v4264_v58, %v4264_v58 }
 0x13e   : > { %v3780_v2 = vpop.eup %3779  ;;  %2109 = vxpose.xlu1.c.b16.cont [2/4] (short) %v1621_v37, 128  ;;  %v1572_v30 = vmul.f32 %v4390_v31, %v1540_v35  ;;  %v701_v45 = vsel %vm293_vm0, %v633_v43, 0.0  ;;  %v639_v35 = vmul.f32 %v4324_v15, %v4324_v15  ;;  %v3715_v15 = vld [vmem:[%s4226_s29 + $0x58] sm:$0xff]  }
 0x13f   : > { %v3782_v26 = vpop.eup %3781  ;;  %v1543_v51 = vadd.f32 0.0001, %v3780_v2  ;;  %v630_v2 = vmul.f32 %v4276_v63, %v4276_v63 }
 0x140   : > { %v1542_v50 = vadd.f32 0.0001, %v3782_v26  ;;  %v1622_v32 = vpack.c.bf16 %v1573_v57, %v1572_v30  ;;  %v686_v57 = vsel %vm293_vm0, %v628_v34, 0.0  ;;  %v719_v58 = vsel %vm293_vm0, %v639_v35, 0.0 }
 0x141   : > { %v1575_v49 = vmul.f32 %v4390_v31, %v1543_v51  ;;  %v641_v30 = vmul.f32 %v4338_v19, %v4338_v19  ;;  %v692_v26 = vsel %vm293_vm0, %v630_v2, 0.0  ;;  %v632_v51 = vmul.f32 %v4285_v4, %v4285_v4 }
 0x142   : > { %2110 = vxpose.xlu1.c.b16.cont [3/4] (short) %v1622_v32, 128  ;;  %v1574_v18 = vmul.f32 %v4390_v31, %v1542_v50  ;;  %v625_v31 = vmul.f32 %v4245_v52, %v4245_v52  ;;  %v621_v52 = vmul.f32 %v4213_v44, %v4213_v44  ;;  %v683_v44 = vsel %vm293_vm0, %v627_v6, 0.0 }
 0x143   : > { %v725_v63 = vsel %vm293_vm0, %v641_v30, 0.0  ;;  %v635_v50 = vmul.f32 %v4304_v9, %v4304_v9  ;;  %v637_v9 = vmul.f32 %v4314_v12, %v4314_v12  ;;  %v643_v12 = vmul.f32 %v4348_v22, %v4348_v22 }
 0x144   : > { %v1623_v8 = vpack.c.bf16 %v1575_v49, %v1574_v18  ;;  %v677_v14 = vsel %vm293_vm0, %v625_v31, 0.0  ;;  %v665_v42 = vsel %vm293_vm0, %v621_v52, 0.0  ;;  %v698_v49 = vsel %vm293_vm0, %v632_v51, 0.0 }
 0x145   : > { %v634_v18 = vmul.f32 %v4299_v7, %v4299_v7  ;;  %v707_v4 = vsel %vm293_vm0, %v635_v50, 0.0  ;;  %v640_v7 = vmul.f32 %v4333_v17, %v4333_v17  ;;  %v731_v22 = vsel %vm293_vm0, %v643_v12, 0.0 }
 0x146   : > { %2111 = vxpose.xlu1.c.b16.end [4/4] (short) %v1623_v8, 128  ;;  %v3716_v8 = vld [vmem:[%s4226_s29 + $0x68] sm:$0xff]  }
 0x147   : > { %v704_v56 = vsel %vm293_vm0, %v634_v18, 0.0  ;;  %v722_v38 = vsel %vm293_vm0, %v640_v7, 0.0 }
 0x153   : > { %648 = vadd.xlane.f32.xlu0 %v647_v29 }
 0x157   : > { %654 = vadd.xlane.f32.xlu0 %v653_v13  ;;  %v713_v13 = vsel %vm293_vm0, %v637_v9, 0.0 }
 0x15b   : > { %672 = vadd.xlane.f32.xlu0 %v671_v33  ;;  %v4546_v33 = vpop.f32.mrb[0].mxu0 }
 0x15c   : > { %v4556_v40 = vpop.f32.mrb[1].mxu0 }
 0x15d   : > { %v4559_v47 = vpop.f32.mrb[2].mxu0 }
 0x15e   : > { %v4567_v60 = vpop.f32.mrb[3].mxu0 }
 0x15f   : > { %678 = vadd.xlane.f32.xlu0 %v677_v14  ;;  %v642_v14 = vmul.f32 %v4345_v20, %v4345_v20 }
 0x161   : > { %v728_v52 = vsel %vm293_vm0, %v642_v14, 0.0 }
 0x163   : > { %651 = vadd.xlane.f32.xlu1 %v650_v62  ;;  %660 = vadd.xlane.f32.xlu0 %v659_v21  ;;  %v3718_v62 = vld [vmem:[%s4226_s29 + $0x78] sm:$0xff]  }
 0x167   : > { %657 = vadd.xlane.f32.xlu1 %v656_v39  ;;  %666 = vadd.xlane.f32.xlu0 %v665_v42  ;;  %v636_v39 = vmul.f32 %v4311_v10, %v4311_v10  ;;  %v4569_v42 = vpop.f32.mrb[4].mxu0 }
 0x168   : > { %v4576_v46 = vpop.f32.mrb[5].mxu0 }
 0x169   : > { %v710_v28 = vsel %vm293_vm0, %v636_v39, 0.0 }
 0x16b   : > { %675 = vadd.xlane.f32.xlu1 %v674_v41  ;;  %684 = vadd.xlane.f32.xlu0 %v683_v44  ;;  %v5080_v44 = vld [vmem:[#allocation5_spill] sm:$0xff] }
 0x16c   : > { %v638_v10 = vmul.f32 %v5080_v44, %v5080_v44 }
 0x16e   : > { %v716_v59 = vsel %vm293_vm0, %v638_v10, 0.0 }
 0x16f   : > { %681 = vadd.xlane.f32.xlu1 %v680_v48  ;;  %690 = vadd.xlane.f32.xlu0 %v689_v54  ;;  %v4578_v48 = vpop.f32.mrb[6].mxu0 }
 0x170   : > { %v1632_v53 = vpop.trf.xlu0  ;;  %v4585_v61 = vpop.f32.mrb[7].mxu0 }
 0x171   : > { %3454 = vmatprep.mubr.msk.bf16.mxu0 %vm1664_vm2, %v1632_v53  ;;  %v5081_v53 = vld [vmem:[#allocation6_spill] sm:$0xff]  ;;  %v4592_v34 = vpop.f32.mrb[8].mxu0 }
 0x173   : > { %663 = vadd.xlane.f32.xlu1 %v662_v27  ;;  %696 = vadd.xlane.f32.xlu0 %v695_v16  ;;  %v644_v27 = vmul.f32 %v5081_v53, %v5081_v53 }
 0x174   : > { %v1633_v1 = vpop.trf.xlu0 }
 0x175   : > { %3455 = vmatmul.mubr.msk.bf16.vlgmr.msra.gmra.mrb[32].mxu0 %vm1664_vm2, %v1633_v1  ;;  %v5082_v1 = vld [vmem:[#allocation7_spill] sm:$0xff] }
 0x176   : > { %3495 = vmatpush3.bf16.msra.mxu0 %v4384_v11 }
 0x177   : > { %669 = vadd.xlane.f32.xlu1 %v668_v36  ;;  %3496 = vmatprep.subr.bf16.mxu0 %v3712_v0  ;;  %v646_v36 = vmul.f32 %v5082_v1, %v5082_v1 }
 0x178   : > { %v1634_v37 = vpop.trf.xlu0  ;;  %702 = vadd.xlane.f32.xlu0 %v701_v45  ;;  %v4594_v45 = vpop.f32.mrb[9].mxu0 }
 0x179   : > { %3458 = vmatprep.mubr.msk.bf16.mxu0 %vm1664_vm2, %v1634_v37  ;;  %v740_v37 = vsel %vm293_vm0, %v646_v36, 0.0 }
 0x17a   : > { %3497 = vmatpush3.bf16.msra.mxu0 %v3712_v0  ;;  %v734_v0 = vsel %vm293_vm0, %v644_v27, 0.0 }
 0x17b   : > { %687 = vadd.xlane.f32.xlu1 %v686_v57  ;;  %3498 = vmatprep.subr.bf16.mxu0 %v3713_v5  ;;  %v4599_v57 = vpop.f32.mrb[10].mxu0 }
 0x17c   : > { %v1635_v11 = vpop.trf.xlu0  ;;  %720 = vadd.xlane.f32.xlu0 %v719_v58  ;;  %v4601_v2 = vpop.f32.mrb[11].mxu0 }
 0x17d   : > { %3459 = vmatmul.mubr.msk.bf16.gmra.mrb[36].mxu0 %vm1664_vm2, %v1635_v11 }
 0x17e   : > { %3499 = vmatpush3.bf16.msra.mxu0 %v3713_v5 }
 0x17f   : > { %693 = vadd.xlane.f32.xlu1 %v692_v26  ;;  %3500 = vmatprep.subr.bf16.mxu0 %v3715_v15 }
 0x180   : > { %v1636_v19 = vpop.trf.xlu0  ;;  %v1794_v32 = vpop.trf.xlu1  ;;  %726 = vadd.xlane.f32.xlu0 %v725_v63 }
 0x181   : > { %3462 = vmatprep.mubr.msk.bf16.mxu0 %vm1664_vm2, %v1636_v19  ;;  %3478 = vmatprep.mubr.msk.bf16.mxu1 %vm1664_vm2, %v1794_v32 }
 0x182   : > { %3501 = vmatpush3.bf16.msra.mxu0 %v3715_v15  ;;  %v4605_v15 = vpop.f32.mrb[12].mxu0 }
 0x183   : > { %699 = vadd.xlane.f32.xlu1 %v698_v49  ;;  %v4607_v11 = vpop.f32.mrb[13].mxu0 }
 0x184   : > { %v1637_v23 = vpop.trf.xlu0  ;;  %v1795_v29 = vpop.trf.xlu1  ;;  %708 = vadd.xlane.f32.xlu0 %v707_v4 }
 0x185   : > { %3479 = vmatmul.mubr.msk.bf16.vlgmr.msra.gmra.mrb[32].mxu1 %vm1664_vm2, %v1795_v29  ;;  %3463 = vmatmul.mubr.msk.bf16.gmra.mrb[40].mxu0 %vm1664_vm2, %v1637_v23  ;;  %v4611_v63 = vpop.f32.mrb[14].mxu0 }
 0x186   : > { %3519 = vmatpush3.bf16.msra.mxu1 %v4410_v3  ;;  %v645_v3 = vmul.f32 %v4358_v25, %v4358_v25  ;;  %v4613_v50 = vpop.f32.mrb[15].mxu0 }
 0x187   : > { %705 = vadd.xlane.f32.xlu1 %v704_v56  ;;  %3520 = vmatprep.subr.bf16.mxu1 %v3716_v8  ;;  %v4617_v49 = vpop.f32.mrb[16].mxu0 }
 0x188   : > { %v1638_v31 = vpop.trf.xlu0  ;;  %v1796_v17 = vpop.trf.xlu1  ;;  %714 = vadd.xlane.f32.xlu0 %v713_v13  ;;  %v737_v25 = vsel %vm293_vm0, %v645_v3, 0.0 }
 0x189   : > { %3466 = vmatprep.mubr.msk.bf16.mxu0 %vm1664_vm2, %v1638_v31  ;;  %3482 = vmatprep.mubr.msk.bf16.mxu1 %vm1664_vm2, %v1796_v17  ;;  %v4619_v18 = vpop.f32.mrb[17].mxu0 }
 0x18a   : > { %3521 = vmatpush3.bf16.msra.mxu1 %v3716_v8  ;;  %v4623_v8 = vpop.f32.mrb[18].mxu0 }
 0x18b   : > { %723 = vadd.xlane.f32.xlu1 %v722_v38  ;;  %3522 = vmatprep.subr.bf16.mxu1 %v3717_v24  ;;  %v4625_v23 = vpop.f32.mrb[19].mxu0 }
 0x18c   : > { %v1639_v21 = vpop.trf.xlu0  ;;  %v1797_v20 = vpop.trf.xlu1  ;;  %732 = vadd.xlane.f32.xlu0 %v731_v22 }
 0x18d   : > { %3483 = vmatmul.mubr.msk.bf16.gmra.mrb[36].mxu1 %vm1664_vm2, %v1797_v20  ;;  %3467 = vmatmul.mubr.msk.bf16.gmra.mrb[44].mxu0 %vm1664_vm2, %v1639_v21  ;;  %v4628_v56 = vpop.f32.mrb[20].mxu0 }
 0x18e   : > { %3523 = vmatpush3.bf16.msra.mxu1 %v3717_v24  ;;  %v4630_v7 = vpop.f32.mrb[21].mxu0 }
 0x18f   : > { %729 = vadd.xlane.f32.xlu1 %v728_v52  ;;  %3524 = vmatprep.subr.bf16.mxu1 %v3718_v62  ;;  %v4633_v12 = vpop.f32.mrb[22].mxu0 }
 0x190   : > { %v1798_v6 = vpop.trf.xlu1  ;;  %v1955_v41 = vpop.trf.xlu0  ;;  %738 = vadd.xlane.f32.xlu0 %v737_v25 }
 0x191   : > { %3486 = vmatprep.mubr.msk.bf16.mxu1 %vm1664_vm2, %v1798_v6  ;;  %3502 = vmatprep.mubr.msk.bf16.mxu0 %vm1664_vm2, %v1955_v41  ;;  %v4635_v24 = vpop.f32.mrb[23].mxu0 }
 0x192   : > { %3525 = vmatpush3.bf16.msra.mxu1 %v3718_v62  ;;  %v4638_v17 = vpop.f32.mrb[24].mxu0 }
 0x193   : > { %711 = vadd.xlane.f32.xlu1 %v710_v28  ;;  %v4640_v38 = vpop.f32.mrb[25].mxu0 }
 0x194   : > { %v1799_v55 = vpop.trf.xlu1  ;;  %v1956_v54 = vpop.trf.xlu0 }
 0x195   : > { %3487 = vmatmul.mubr.msk.bf16.gmra.mrb[40].mxu1 %vm1664_vm2, %v1799_v55  ;;  %3503 = vmatmul.mubr.msk.bf16.vlgmr.msra.gmra.mrb[48].mxu0 %vm1664_vm2, %v1956_v54  ;;  %v4643_v22 = vpop.f32.mrb[26].mxu0 }
 0x196   : > { %v4645_v3 = vpop.f32.mrb[27].mxu0 }
 0x197   : > { %717 = vadd.xlane.f32.xlu1 %v716_v59  ;;  %v4647_v62 = vpop.f32.mrb[28].mxu0 }
 0x198   : > { %v1800_v16 = vpop.trf.xlu1  ;;  %v1957_v43 = vpop.trf.xlu0 }
 0x199   : > { %3490 = vmatprep.mubr.msk.bf16.mxu1 %vm1664_vm2, %v1800_v16  ;;  %3506 = vmatprep.mubr.msk.bf16.mxu0 %vm1664_vm2, %v1957_v43  ;;  %v4649_v21 = vpop.f32.mrb[29].mxu0 }
 0x19a   : > { %v4651_v20 = vpop.f32.mrb[30].mxu0 }
 0x19b   : > { %735 = vadd.xlane.f32.xlu1 %v734_v0  ;;  %v4653_v52 = vpop.f32.mrb[31].mxu0 }
 0x19c   : > { %v1801_v35 = vpop.trf.xlu1  ;;  %v1958_v5 = vpop.trf.xlu0 }
 0x19d   : > { %3491 = vmatmul.mubr.msk.bf16.gmra.mrb[44].mxu1 %vm1664_vm2, %v1801_v35  ;;  %3507 = vmatmul.mubr.msk.bf16.gmra.mrb[52].mxu0 %vm1664_vm2, %v1958_v5 }
 0x19f   : > { %741 = vadd.xlane.f32.xlu1 %v740_v37 }
 0x1a0   : > { %v1959_v58 = vpop.trf.xlu0  ;;  %v2116_v30 = vpop.trf.xlu1 }
 0x1a1   : > { %3526 = vmatprep.mubr.msk.bf16.mxu1 %vm1664_vm2, %v2116_v30  ;;  %3510 = vmatprep.mubr.msk.bf16.mxu0 %vm1664_vm2, %v1959_v58 }
 0x1a4   : > { %v1960_v26 = vpop.trf.xlu0  ;;  %v2117_v51 = vpop.trf.xlu1 }
 0x1a5   : > { %3527 = vmatmul.mubr.msk.bf16.vlgmr.msra.gmra.mrb[48].mxu1 %vm1664_vm2, %v2117_v51  ;;  %3511 = vmatmul.mubr.msk.bf16.gmra.mrb[56].mxu0 %vm1664_vm2, %v1960_v26 }
 0x1a8   : > { %v1961_v19 = vpop.trf.xlu0  ;;  %v2118_v32 = vpop.trf.xlu1 }
 0x1a9   : > { %3530 = vmatprep.mubr.msk.bf16.mxu1 %vm1664_vm2, %v2118_v32  ;;  %3514 = vmatprep.mubr.msk.bf16.mxu0 %vm1664_vm2, %v1961_v19 }
 0x1ac   : > { %v1962_v4 = vpop.trf.xlu0  ;;  %v2119_v9 = vpop.trf.xlu1 }
 0x1ad   : > { %3515 = vmatmul.mubr.msk.bf16.gmra.mrb[60].mxu0 %vm1664_vm2, %v1962_v4  ;;  %3531 = vmatmul.mubr.msk.bf16.gmra.mrb[52].mxu1 %vm1664_vm2, %v2119_v9 }
 0x1b0   : > { %v2120_v29 = vpop.trf.xlu1 }
 0x1b1   : > { %3534 = vmatprep.mubr.msk.bf16.mxu1 %vm1664_vm2, %v2120_v29 }
 0x1b4   : > { %v2121_v13 = vpop.trf.xlu1 }
 0x1b5   : > { %3535 = vmatmul.mubr.msk.bf16.gmra.mrb[56].mxu1 %vm1664_vm2, %v2121_v13 }
 0x1b8   : > { %v2122_v31 = vpop.trf.xlu1 }
 0x1b9   : > { %3538 = vmatprep.mubr.msk.bf16.mxu1 %vm1664_vm2, %v2122_v31 }
 0x1bc   : > { %v2123_v14 = vpop.trf.xlu1 }
 0x1bd   : > { %3539 = vmatmul.mubr.msk.bf16.gmra.mrb[60].mxu1 %vm1664_vm2, %v2123_v14 }
 0x1e0   : > { %v649_v39 = vpop.xlane.xlu0 %648 }
 0x1e1   : > { %v743_v41 = vmul.f32 0.5, %v649_v39 }
 0x1e3   : > { %v775_v10 = vsub.f32 %v4556_v40, %v743_v41 }
 0x1e4   : > { %v655_v25 = vpop.xlane.xlu0 %654 }
 0x1e5   : > { %v745_v6 = vmul.f32 0.5, %v655_v25  ;;  %v807_v59 = vmul.f32 1.442695, %v775_v10 }
 0x1e7   : > { %v777_v28 = vsub.f32 %v4567_v60, %v745_v6  ;;  %3783 = vpow2.f32 %v807_v59 }
 0x1e8   : > { %v673_v44 = vpop.xlane.xlu0 %672 }
 0x1e9   : > { %v751_v54 = vmul.f32 0.5, %v673_v44  ;;  %v811_v0 = vmul.f32 1.442695, %v777_v28 }
 0x1eb   : > { %v783_v1 = vsub.f32 %v4594_v45, %v751_v54  ;;  %3785 = vpow2.f32 %v811_v0 }
 0x1ec   : > { %v679_v55 = vpop.xlane.xlu0 %678 }
 0x1ed   : > { %v753_v43 = vmul.f32 0.5, %v679_v55  ;;  %v823_v40 = vmul.f32 1.442695, %v783_v1 }
 0x1ef   : > { %v785_v30 = vsub.f32 %v4601_v2, %v753_v43 }
 0x1f0   : > { %v652_v53 = vpop.xlane.xlu1 %651  ;;  %v661_v27 = vpop.xlane.xlu0 %660 }
 0x1f1   : > { %v744_v16 = vmul.f32 0.5, %v652_v53  ;;  %v747_v58 = vmul.f32 0.5, %v661_v27  ;;  %v827_v9 = vmul.f32 1.442695, %v785_v30  ;;  %v3784_v14 = vpop.eup %3783 }
 0x1f2   : > { %v871_v28 = vadd.f32 0.0001, %v3784_v14 }
 0x1f3   : > { %v776_v36 = vsub.f32 %v4546_v33, %v744_v16  ;;  %v779_v45 = vsub.f32 %v4576_v46, %v747_v58 }
 0x1f4   : > { %v658_v35 = vpop.xlane.xlu1 %657  ;;  %v667_v5 = vpop.xlane.xlu0 %666 }
 0x1f5   : > { %v746_v37 = vmul.f32 0.5, %v658_v35  ;;  %v809_v60 = vmul.f32 1.442695, %v776_v36  ;;  %v749_v33 = vmul.f32 0.5, %v667_v5  ;;  %v815_v2 = vmul.f32 1.442695, %v779_v45  ;;  %v3786_v46 = vpop.eup %3785 }
 0x1f6   : > { %v4667_v0 = vadd.f32 0.0001, %v3786_v46 }
 0x1f7   : > { %3787 = vpow2.f32 %v809_v60  ;;  %v778_v26 = vsub.f32 %v4559_v47, %v746_v37  ;;  %v781_v47 = vsub.f32 %v4585_v61, %v749_v33 }
 0x1f8   : > { %v676_v51 = vpop.xlane.xlu1 %675  ;;  %v685_v19 = vpop.xlane.xlu0 %684  ;;  %3789 = vpow2.f32 %v823_v40 }
 0x1f9   : > { %v752_v32 = vmul.f32 0.5, %v676_v51  ;;  %v813_v4 = vmul.f32 1.442695, %v778_v26  ;;  %v755_v6 = vmul.f32 0.5, %v685_v19  ;;  %v819_v53 = vmul.f32 1.442695, %v781_v47 }
 0x1fb   : > { %3791 = vpow2.f32 %v813_v4  ;;  %v784_v29 = vsub.f32 %v4592_v34, %v752_v32  ;;  %v787_v16 = vsub.f32 %v4607_v11, %v755_v6 }
 0x1fc   : > { %v682_v13 = vpop.xlane.xlu1 %681  ;;  %v691_v31 = vpop.xlane.xlu0 %690  ;;  %3793 = vpow2.f32 %v827_v9 }
 0x1fd   : > { %v754_v39 = vmul.f32 0.5, %v682_v13  ;;  %v825_v25 = vmul.f32 1.442695, %v784_v29  ;;  %v757_v27 = vmul.f32 0.5, %v691_v31  ;;  %v831_v40 = vmul.f32 1.442695, %v787_v16 }
 0x1ff   : > { %3795 = vpow2.f32 %v825_v25  ;;  %v786_v41 = vsub.f32 %v4599_v57, %v754_v39  ;;  %v789_v11 = vsub.f32 %v4613_v50, %v757_v27 }
 0x200   : > { %v664_v44 = vpop.xlane.xlu1 %663  ;;  %v697_v10 = vpop.xlane.xlu0 %696  ;;  %3797 = vpow2.f32 %v815_v2 }
 0x201   : > { %v3788_v55 = vpop.eup %3787  ;;  %v748_v54 = vmul.f32 0.5, %v664_v44  ;;  %v829_v34 = vmul.f32 1.442695, %v786_v41  ;;  %v759_v37 = vmul.f32 0.5, %v697_v10  ;;  %v835_v31 = vmul.f32 1.442695, %v789_v11 }
 0x202   : > { %v872_v59 = vadd.f32 0.0001, %v3788_v55  ;;  %v3790_v43 = vpop.eup %3789 }
 0x203   : > { %v780_v61 = vsub.f32 %v4569_v42, %v748_v54  ;;  %3799 = vpow2.f32 %v829_v34  ;;  %v879_v19 = vadd.f32 0.0001, %v3790_v43  ;;  %v791_v9 = vsub.f32 %v4619_v18, %v759_v37 }
 0x204   : > { %v670_v57 = vpop.xlane.xlu1 %669  ;;  %v2269_v1 = vpack.c.bf16 %v872_v59, %v871_v28  ;;  %3801 = vpow2.f32 %v819_v53 }
 0x205   : > { %v3792_v36 = vpop.eup %3791  ;;  %v817_v35 = vmul.f32 1.442695, %v780_v61  ;;  %v750_v5 = vmul.f32 0.5, %v670_v57  ;;  %v703_v60 = vpop.xlane.xlu0 %702  ;;  %v839_v41 = vmul.f32 1.442695, %v791_v9 }
 0x206   : > { %v4669_v58 = vadd.f32 0.0001, %v3792_v36  ;;  %3558 = vmatprep.mubr.bf16.mxu0 %v2269_v1  ;;  %v3794_v30 = vpop.eup %3793  ;;  %v761_v13 = vmul.f32 0.5, %v703_v60 }
 0x207   : > { %3803 = vpow2.f32 %v817_v35  ;;  %v782_v42 = vsub.f32 %v4578_v48, %v750_v5  ;;  %v4677_v39 = vadd.f32 0.0001, %v3794_v30 }
 0x208   : > { %v2270_v26 = vpack.c.bf16 %v4669_v58, %v4667_v0  ;;  %v688_v51 = vpop.xlane.xlu1 %687  ;;  %3805 = vpow2.f32 %v831_v40  ;;  %v793_v44 = vsub.f32 %v4625_v23, %v761_v13 }
 0x209   : > { %v3796_v32 = vpop.eup %3795  ;;  %v821_v4 = vmul.f32 1.442695, %v782_v42  ;;  %v756_v45 = vmul.f32 0.5, %v688_v51  ;;  %v721_v33 = vpop.xlane.xlu0 %720 }
 0x20a   : > { %v880_v29 = vadd.f32 0.0001, %v3796_v32  ;;  %v3798_v50 = vpop.eup %3797  ;;  %v767_v18 = vmul.f32 0.5, %v721_v33  ;;  %v843_v23 = vmul.f32 1.442695, %v793_v44 }
 0x20b   : > { %3807 = vpow2.f32 %v821_v4  ;;  %v788_v48 = vsub.f32 %v4605_v15, %v756_v45  ;;  %v4683_v55 = vadd.f32 0.0001, %v3798_v50 }
 0x20c   : > { %v694_v14 = vpop.xlane.xlu1 %693  ;;  %v2273_v2 = vpack.c.bf16 %v880_v29, %v879_v19  ;;  %3809 = vpow2.f32 %v835_v31  ;;  %v799_v57 = vsub.f32 %v4640_v38, %v767_v18 }
 0x20d   : > { %v3800_v25 = vpop.eup %3799  ;;  %v758_v47 = vmul.f32 0.5, %v694_v14  ;;  %v833_v6 = vmul.f32 1.442695, %v788_v48  ;;  %v727_v46 = vpop.xlane.xlu0 %726 }
 0x20e   : > { %v4679_v28 = vadd.f32 0.0001, %v3800_v25  ;;  %3582 = vmatprep.mubr.bf16.mxu1 %v2273_v2  ;;  %v3802_v15 = vpop.eup %3801  ;;  %v769_v43 = vmul.f32 0.5, %v727_v46  ;;  %v855_v51 = vmul.f32 1.442695, %v799_v57 }
 0x20f   : > { %3811 = vpow2.f32 %v833_v6  ;;  %v790_v10 = vsub.f32 %v4611_v63, %v758_v47  ;;  %v4691_v36 = vadd.f32 0.0001, %v3802_v15 }
 0x210   : > { %v2274_v54 = vpack.c.bf16 %v4679_v28, %v4677_v39  ;;  %v700_v34 = vpop.xlane.xlu1 %699  ;;  %3813 = vpow2.f32 %v839_v41  ;;  %v801_v38 = vsub.f32 %v4645_v3, %v769_v43 }
 0x211   : > { %v3804_v59 = vpop.eup %3803  ;;  %v760_v53 = vmul.f32 0.5, %v700_v34  ;;  %v837_v27 = vmul.f32 1.442695, %v790_v10  ;;  %v709_v16 = vpop.xlane.xlu0 %708 }
 0x212   : > { %v4687_v61 = vadd.f32 0.0001, %v3804_v59  ;;  %v3806_v1 = vpop.eup %3805  ;;  %v763_v11 = vmul.f32 0.5, %v709_v16  ;;  %v859_v3 = vmul.f32 1.442695, %v801_v38 }
 0x213   : > { %3815 = vpow2.f32 %v837_v27  ;;  %v792_v63 = vsub.f32 %v4617_v49, %v760_v53  ;;  %v4699_v32 = vadd.f32 0.0001, %v3806_v1 }
 0x214   : > { %v706_v35 = vpop.xlane.xlu1 %705  ;;  %v2271_v5 = vpack.c.bf16 %v4687_v61, %v4683_v55  ;;  %3817 = vpow2.f32 %v843_v23  ;;  %v795_v13 = vsub.f32 %v4630_v7, %v763_v11 }
 0x215   : > { %v3808_v37 = vpop.eup %3807  ;;  %v762_v60 = vmul.f32 0.5, %v706_v35  ;;  %v841_v40 = vmul.f32 1.442695, %v792_v63  ;;  %v715_v42 = vpop.xlane.xlu0 %714 }
 0x216   : > { %v4695_v30 = vadd.f32 0.0001, %v3808_v37  ;;  %v3810_v19 = vpop.eup %3809  ;;  %v765_v48 = vmul.f32 0.5, %v715_v42  ;;  %v847_v46 = vmul.f32 1.442695, %v795_v13 }
 0x217   : > { %3819 = vpow2.f32 %v841_v40  ;;  %v794_v49 = vsub.f32 %v4623_v8, %v762_v60  ;;  %v4707_v2 = vadd.f32 0.0001, %v3810_v19 }
 0x218   : > { %v724_v4 = vpop.xlane.xlu1 %723  ;;  %v2272_v45 = vpack.c.bf16 %v4695_v30, %v4691_v36  ;;  %3821 = vpow2.f32 %v855_v51  ;;  %v797_v44 = vsub.f32 %v4635_v24, %v765_v48 }
 0x219   : > { %v3812_v33 = vpop.eup %3811  ;;  %v768_v9 = vmul.f32 0.5, %v724_v4  ;;  %v845_v29 = vmul.f32 1.442695, %v794_v49  ;;  %v733_v31 = vpop.xlane.xlu0 %732 }
 0x21a   : > { %v4704_v50 = vadd.f32 0.0001, %v3812_v33  ;;  %v3814_v14 = vpop.eup %3813  ;;  %v771_v10 = vmul.f32 0.5, %v733_v31  ;;  %v851_v24 = vmul.f32 1.442695, %v797_v44 }
 0x21b   : > { %3823 = vpow2.f32 %v845_v29  ;;  %v800_v8 = vsub.f32 %v4638_v17, %v768_v9  ;;  %v4715_v59 = vadd.f32 0.0001, %v3814_v14 }
 0x21c   : > { %v730_v25 = vpop.xlane.xlu1 %729  ;;  %v2275_v47 = vpack.c.bf16 %v4704_v50, %v4699_v32  ;;  %3825 = vpow2.f32 %v859_v3  ;;  %v803_v63 = vsub.f32 %v4649_v21, %v771_v10 }
 0x21d   : > { %v3816_v6 = vpop.eup %3815  ;;  %v770_v41 = vmul.f32 0.5, %v730_v25  ;;  %v857_v7 = vmul.f32 1.442695, %v800_v8  ;;  %v739_v17 = vpop.xlane.xlu0 %738 }
 0x21e   : > { %v4711_v18 = vadd.f32 0.0001, %v3816_v6  ;;  %v3818_v34 = vpop.eup %3817  ;;  %v773_v1 = vmul.f32 0.5, %v739_v17  ;;  %v863_v49 = vmul.f32 1.442695, %v803_v63 }
 0x21f   : > { %3827 = vpow2.f32 %v857_v7  ;;  %v802_v15 = vsub.f32 %v4643_v22, %v770_v41  ;;  %v4723_v37 = vadd.f32 0.0001, %v3818_v34 }
 0x220   : > { %v712_v53 = vpop.xlane.xlu1 %711  ;;  %v2276_v27 = vpack.c.bf16 %v4711_v18, %v4707_v2  ;;  %3829 = vpow2.f32 %v847_v46  ;;  %v805_v21 = vsub.f32 %v4653_v52, %v773_v1 }
 0x221   : > { %v3820_v16 = vpop.eup %3819  ;;  %v764_v43 = vmul.f32 0.5, %v712_v53  ;;  %v861_v23 = vmul.f32 1.442695, %v802_v15 }
 0x222   : > { %v4719_v57 = vadd.f32 0.0001, %v3820_v16  ;;  %v3822_v35 = vpop.eup %3821  ;;  %v867_v3 = vmul.f32 1.442695, %v805_v21 }
 0x223   : > { %v796_v22 = vsub.f32 %v4628_v56, %v764_v43  ;;  %3831 = vpow2.f32 %v861_v23  ;;  %v4733_v33 = vadd.f32 0.0001, %v3822_v35 }
 0x224   : > { %v718_v60 = vpop.xlane.xlu1 %717  ;;  %v2277_v40 = vpack.c.bf16 %v4719_v57, %v4715_v59  ;;  %3833 = vpow2.f32 %v851_v24 }
 0x225   : > { %v3824_v11 = vpop.eup %3823  ;;  %v849_v42 = vmul.f32 1.442695, %v796_v22  ;;  %v766_v51 = vmul.f32 0.5, %v718_v60 }
 0x226   : > { %v4727_v38 = vadd.f32 0.0001, %v3824_v11  ;;  %v3826_v19 = vpop.eup %3825 }
 0x227   : > { %3835 = vpow2.f32 %v849_v42  ;;  %v798_v56 = vsub.f32 %v4633_v12, %v766_v51  ;;  %v4738_v8 = vadd.f32 0.0001, %v3826_v19 }
 0x228   : > { %v2278_v4 = vpack.c.bf16 %v4727_v38, %v4723_v37  ;;  %v736_v9 = vpop.xlane.xlu1 %735  ;;  %3837 = vpow2.f32 %v863_v49  ;;  %v3976_v37 = vmov 32  }
 0x229   : > { %v3828_v29 = vpop.eup %3827  ;;  %v853_v13 = vmul.f32 1.442695, %v798_v56  ;;  %v772_v31 = vmul.f32 0.5, %v736_v9  ;;  %3701 = vset.pattern.permute.xlu1 %v3976_v37  ;;  %3702 = vset.pattern.permute.xlu0 %v3976_v37 }
 0x22a   : > { %v4735_v48 = vadd.f32 0.0001, %v3828_v29  ;;  %v3830_v14 = vpop.eup %3829 }
 0x22b   : > { %3839 = vpow2.f32 %v853_v13  ;;  %v804_v52 = vsub.f32 %v4647_v62, %v772_v31  ;;  %v4745_v15 = vadd.f32 0.0001, %v3830_v14 }
 0x22c   : > { %v742_v12 = vpop.xlane.xlu1 %741  ;;  %v2281_v25 = vpack.c.bf16 %v4735_v48, %v4733_v33  ;;  %3841 = vpow2.f32 %v867_v3 }
 0x22d   : > { %v3832_v6 = vpop.eup %3831  ;;  %v865_v41 = vmul.f32 1.442695, %v804_v52  ;;  %v774_v46 = vmul.f32 0.5, %v742_v12 }
 0x22e   : > { %v4742_v7 = vadd.f32 0.0001, %v3832_v6  ;;  %v3834_v10 = vpop.eup %3833 }
 0x22f   : > { %3843 = vpow2.f32 %v865_v41  ;;  %v806_v44 = vsub.f32 %v4651_v20, %v774_v46  ;;  %v4751_v43 = vadd.f32 0.0001, %v3834_v10 }
 0x230   : > { %v2282_v62 = vpack.c.bf16 %v4742_v7, %v4738_v8 }
 0x231   : > { %v3836_v17 = vpop.eup %3835  ;;  %v869_v34 = vmul.f32 1.442695, %v806_v44 }
 0x232   : > { %v4749_v53 = vadd.f32 0.0001, %v3836_v17  ;;  %v3838_v16 = vpop.eup %3837 }
 0x233   : > { %3845 = vpow2.f32 %v869_v34  ;;  %v4757_v1 = vadd.f32 0.0001, %v3838_v16 }
 0x234   : > { %v2279_v23 = vpack.c.bf16 %v4749_v53, %v4745_v15 }
 0x235   : > { %v3840_v24 = vpop.eup %3839 }
 0x236   : > { %v4755_v63 = vadd.f32 0.0001, %v3840_v24  ;;  %v3842_v20 = vpop.eup %3841 }
 0x237   : > { %v4763_v11 = vadd.f32 0.0001, %v3842_v20 }
 0x238   : > { %v2280_v22 = vpack.c.bf16 %v4755_v63, %v4751_v43 }
 0x239   : > { %v3844_v35 = vpop.eup %3843 }
 0x23a   : > { %v4761_v60 = vadd.f32 0.0001, %v3844_v35 }
 0x23c   : > { %v2283_v42 = vpack.c.bf16 %v4761_v60, %v4757_v1 }
 0x23d   : > { %v3846_v51 = vpop.eup %3845 }
 0x23e   : > { %v4767_v49 = vadd.f32 0.0001, %v3846_v51 }
 0x240   : > { %v2284_v21 = vpack.c.bf16 %v4767_v49, %v4763_v11 }
 0x248   : > { %v3456_v56 = vpop.f32.mrb[32].mxu0 }
 0x249   : > { %v1723_v19 = vpop.f32.mrb[33].mxu0 }
 0x24a   : > { %v3457_v9 = vpop.f32.mrb[34].mxu0 }
 0x24b   : > { %v2286_v29 = vpack.c.bf16 %v3457_v9, %v3456_v56  ;;  %v1726_v13 = vpop.f32.mrb[35].mxu0 }
 0x24c   : > { %v2285_v31 = vpack.c.bf16 %v1726_v13, %v1723_v19 }
 0x24e   : > { %3542 = vmatprep.subr.bf16.mxu0 %v2285_v31 }
 0x24f   : > { %3543 = vmatpush3.bf16.msra.mxu0 %v2285_v31 }
 0x250   : > { %v3460_v3 = vpop.f32.mrb[36].mxu0  ;;  %3544 = vmatprep.subr.bf16.mxu0 %v2286_v29 }
 0x251   : > { %v1739_v14 = vpop.f32.mrb[37].mxu0 }
 0x252   : > { %v3461_v52 = vpop.f32.mrb[38].mxu0 }
 0x253   : > { %v2288_v12 = vpack.c.bf16 %v3461_v52, %v3460_v3  ;;  %v1742_v6 = vpop.f32.mrb[39].mxu0  ;;  %3545 = vmatpush3.bf16.msra.mxu0 %v2286_v29 }
 0x254   : > { %v2287_v41 = vpack.c.bf16 %v1742_v6, %v1739_v14 }
 0x256   : > { %3546 = vmatprep.subr.bf16.mxu0 %v2287_v41 }
 0x257   : > { %3547 = vmatpush3.bf16.msra.mxu0 %v2287_v41 }
 0x258   : > { %v3464_v46 = vpop.f32.mrb[40].mxu0  ;;  %v3480_v44 = vpop.f32.mrb[32].mxu1  ;;  %3548 = vmatprep.subr.bf16.mxu0 %v2288_v12 }
 0x259   : > { %v1755_v10 = vpop.f32.mrb[41].mxu0  ;;  %v1884_v17 = vpop.f32.mrb[33].mxu1 }
 0x25a   : > { %v3465_v34 = vpop.f32.mrb[42].mxu0  ;;  %v3481_v16 = vpop.f32.mrb[34].mxu1 }
 0x25b   : > { %v2290_v24 = vpack.c.bf16 %v3465_v34, %v3464_v46  ;;  %v2294_v20 = vpack.c.bf16 %v3481_v16, %v3480_v44  ;;  %v1758_v35 = vpop.f32.mrb[43].mxu0  ;;  %v1887_v51 = vpop.f32.mrb[35].mxu1  ;;  %3549 = vmatpush3.bf16.msra.mxu0 %v2288_v12 }
 0x25c   : > { %v2289_v56 = vpack.c.bf16 %v1758_v35, %v1755_v10  ;;  %v2293_v19 = vpack.c.bf16 %v1887_v51, %v1884_v17 }
 0x25e   : > { %3550 = vmatprep.subr.bf16.mxu0 %v2289_v56  ;;  %3566 = vmatprep.subr.bf16.mxu1 %v2293_v19 }
 0x25f   : > { %3551 = vmatpush3.bf16.msra.mxu0 %v2289_v56  ;;  %3567 = vmatpush3.bf16.msra.mxu1 %v2293_v19 }
 0x260   : > { %v3468_v9 = vpop.f32.mrb[44].mxu0  ;;  %v3484_v29 = vpop.f32.mrb[36].mxu1  ;;  %3552 = vmatprep.subr.bf16.mxu0 %v2290_v24  ;;  %3568 = vmatprep.subr.bf16.mxu1 %v2294_v20 }
 0x261   : > { %v1771_v13 = vpop.f32.mrb[45].mxu0  ;;  %v1900_v31 = vpop.f32.mrb[37].mxu1 }
 0x262   : > { %v3469_v3 = vpop.f32.mrb[46].mxu0  ;;  %v3485_v14 = vpop.f32.mrb[38].mxu1 }
 0x263   : > { %v2292_v52 = vpack.c.bf16 %v3469_v3, %v3468_v9  ;;  %v2296_v6 = vpack.c.bf16 %v3485_v14, %v3484_v29  ;;  %v1774_v41 = vpop.f32.mrb[47].mxu0  ;;  %v1903_v46 = vpop.f32.mrb[39].mxu1  ;;  %3553 = vmatpush3.bf16.msra.mxu0 %v2290_v24  ;;  %3569 = vmatpush3.bf16.msra.mxu1 %v2294_v20 }
 0x264   : > { %v2291_v12 = vpack.c.bf16 %v1774_v41, %v1771_v13  ;;  %v2295_v44 = vpack.c.bf16 %v1903_v46, %v1900_v31 }
 0x266   : > { %3554 = vmatprep.subr.bf16.mxu0 %v2291_v12  ;;  %3570 = vmatprep.subr.bf16.mxu1 %v2295_v44 }
 0x267   : > { %3555 = vmatpush3.bf16.msra.mxu0 %v2291_v12  ;;  %3571 = vmatpush3.bf16.msra.mxu1 %v2295_v44 }
 0x268   : > { %v3488_v10 = vpop.f32.mrb[40].mxu1  ;;  %v3504_v17 = vpop.f32.mrb[48].mxu0  ;;  %3556 = vmatprep.subr.bf16.mxu0 %v2292_v52  ;;  %3572 = vmatprep.subr.bf16.mxu1 %v2296_v6 }
 0x269   : > { %v1916_v34 = vpop.f32.mrb[41].mxu1  ;;  %v2045_v16 = vpop.f32.mrb[49].mxu0 }
 0x26a   : > { %v3489_v35 = vpop.f32.mrb[42].mxu1  ;;  %v3505_v51 = vpop.f32.mrb[50].mxu0 }
 0x26b   : > { %v2298_v56 = vpack.c.bf16 %v3489_v35, %v3488_v10  ;;  %v2302_v19 = vpack.c.bf16 %v3505_v51, %v3504_v17  ;;  %v1919_v9 = vpop.f32.mrb[43].mxu1  ;;  %v2048_v29 = vpop.f32.mrb[51].mxu0  ;;  %3557 = vmatpush3.bf16.msra.mxu0 %v2292_v52  ;;  %3573 = vmatpush3.bf16.msra.mxu1 %v2296_v6 }
 0x26c   : > { %v2297_v24 = vpack.c.bf16 %v1919_v9, %v1916_v34  ;;  %v2301_v20 = vpack.c.bf16 %v2048_v29, %v2045_v16 }
 0x26e   : > { %3559 = vmatmul.mubr.bf16.vlgmr.msra.gmra.mrb[64].mxu0 %v2270_v26  ;;  %3574 = vmatprep.subr.bf16.mxu1 %v2297_v24 }
 0x26f   : > { %3590 = vmatprep.subr.bf16.mxu0 %v2301_v20  ;;  %3562 = vmatprep.mubr.bf16.mxu0 %v2271_v5 }
 0x270   : > { %3575 = vmatpush3.bf16.msra.mxu1 %v2297_v24  ;;  %3591 = vmatpush3.bf16.msra.mxu0 %v2301_v20  ;;  %v3492_v13 = vpop.f32.mrb[44].mxu1  ;;  %v3508_v31 = vpop.f32.mrb[52].mxu0 }
 0x271   : > { %v1932_v3 = vpop.f32.mrb[45].mxu1  ;;  %v2061_v14 = vpop.f32.mrb[53].mxu0  ;;  %3576 = vmatprep.subr.bf16.mxu1 %v2298_v56  ;;  %3592 = vmatprep.subr.bf16.mxu0 %v2302_v19 }
 0x272   : > { %v3493_v52 = vpop.f32.mrb[46].mxu1  ;;  %v3509_v6 = vpop.f32.mrb[54].mxu0 }
 0x273   : > { %v2300_v41 = vpack.c.bf16 %v3493_v52, %v3492_v13  ;;  %v2304_v46 = vpack.c.bf16 %v3509_v6, %v3508_v31  ;;  %v1935_v0 = vpop.f32.mrb[47].mxu1  ;;  %v2064_v58 = vpop.f32.mrb[55].mxu0 }
 0x274   : > { %v2299_v26 = vpack.c.bf16 %v1935_v0, %v1932_v3  ;;  %v2303_v12 = vpack.c.bf16 %v2064_v58, %v2061_v14  ;;  %3577 = vmatpush3.bf16.msra.mxu1 %v2298_v56  ;;  %3593 = vmatpush3.bf16.msra.mxu0 %v2302_v19 }
 0x276   : > { %3563 = vmatmul.mubr.bf16.gmra.mrb[68].mxu0 %v2272_v45  ;;  %3578 = vmatprep.subr.bf16.mxu1 %v2299_v26 }
 0x277   : > { %3594 = vmatprep.subr.bf16.mxu0 %v2303_v12  ;;  %3606 = vmatprep.mubr.bf16.mxu0 %v2277_v40 }
 0x278   : > { %3579 = vmatpush3.bf16.msra.mxu1 %v2299_v26  ;;  %3595 = vmatpush3.bf16.msra.mxu0 %v2303_v12  ;;  %v3512_v55 = vpop.f32.mrb[56].mxu0  ;;  %v3528_v61 = vpop.f32.mrb[48].mxu1 }
 0x279   : > { %v2077_v5 = vpop.f32.mrb[57].mxu0  ;;  %v2206_v44 = vpop.f32.mrb[49].mxu1  ;;  %3580 = vmatprep.subr.bf16.mxu1 %v2300_v41  ;;  %3596 = vmatprep.subr.bf16.mxu0 %v2304_v46 }
 0x27a   : > { %v3513_v10 = vpop.f32.mrb[58].mxu0  ;;  %v3529_v17 = vpop.f32.mrb[50].mxu1 }
 0x27b   : > { %v2306_v34 = vpack.c.bf16 %v3513_v10, %v3512_v55  ;;  %v2310_v16 = vpack.c.bf16 %v3529_v17, %v3528_v61  ;;  %v2080_v36 = vpop.f32.mrb[59].mxu0  ;;  %v2209_v30 = vpop.f32.mrb[51].mxu1 }
 0x27c   : > { %v2305_v45 = vpack.c.bf16 %v2080_v36, %v2077_v5  ;;  %v2309_v35 = vpack.c.bf16 %v2209_v30, %v2206_v44  ;;  %3581 = vmatpush3.bf16.msra.mxu1 %v2300_v41  ;;  %3597 = vmatpush3.bf16.msra.mxu0 %v2304_v46 }
 0x27e   : > { %3598 = vmatprep.subr.bf16.mxu0 %v2305_v45  ;;  %3614 = vmatprep.subr.bf16.mxu1 %v2309_v35 }
 0x27f   : > { %3583 = vmatmul.mubr.bf16.vlgmr.msra.gmra.mrb[64].mxu1 %v2274_v54 }
 0x280   : > { %3586 = vmatprep.mubr.bf16.mxu1 %v2275_v47  ;;  %3599 = vmatpush3.bf16.msra.mxu0 %v2305_v45  ;;  %v3516_v59 = vpop.f32.mrb[60].mxu0  ;;  %v3532_v57 = vpop.f32.mrb[52].mxu1 }
 0x281   : > { %3615 = vmatpush3.bf16.msra.mxu1 %v2309_v35  ;;  %v2093_v40 = vpop.f32.mrb[61].mxu0  ;;  %v2222_v51 = vpop.f32.mrb[53].mxu1  ;;  %3600 = vmatprep.subr.bf16.mxu0 %v2306_v34 }
 0x282   : > { %v3517_v56 = vpop.f32.mrb[62].mxu0  ;;  %v3533_v19 = vpop.f32.mrb[54].mxu1  ;;  %3616 = vmatprep.subr.bf16.mxu1 %v2310_v16 }
 0x283   : > { %v2308_v9 = vpack.c.bf16 %v3517_v56, %v3516_v59  ;;  %v2312_v29 = vpack.c.bf16 %v3533_v19, %v3532_v57  ;;  %v2096_v24 = vpop.f32.mrb[63].mxu0  ;;  %v2225_v20 = vpop.f32.mrb[55].mxu1 }
 0x284   : > { %v2307_v39 = vpack.c.bf16 %v2096_v24, %v2093_v40  ;;  %v2311_v28 = vpack.c.bf16 %v2225_v20, %v2222_v51  ;;  %3601 = vmatpush3.bf16.msra.mxu0 %v2306_v34 }
 0x285   : > { %3617 = vmatpush3.bf16.msra.mxu1 %v2310_v16 }
 0x286   : > { %3602 = vmatprep.subr.bf16.mxu0 %v2307_v39  ;;  %3618 = vmatprep.subr.bf16.mxu1 %v2311_v28 }
 0x287   : > { %3587 = vmatmul.mubr.bf16.gmra.mrb[68].mxu1 %v2276_v27 }
 0x288   : > { %3603 = vmatpush3.bf16.msra.mxu0 %v2307_v39  ;;  %3630 = vmatprep.mubr.bf16.mxu1 %v2281_v25  ;;  %v3536_v54 = vpop.f32.mrb[56].mxu1 }
 0x289   : > { %3619 = vmatpush3.bf16.msra.mxu1 %v2311_v28  ;;  %v2238_v32 = vpop.f32.mrb[57].mxu1  ;;  %3604 = vmatprep.subr.bf16.mxu0 %v2308_v9 }
 0x28a   : > { %v3537_v50 = vpop.f32.mrb[58].mxu1  ;;  %3620 = vmatprep.subr.bf16.mxu1 %v2312_v29 }
 0x28b   : > { %v2314_v47 = vpack.c.bf16 %v3537_v50, %v3536_v54  ;;  %v2241_v13 = vpop.f32.mrb[59].mxu1 }
 0x28c   : > { %v2313_v31 = vpack.c.bf16 %v2241_v13, %v2238_v32  ;;  %3605 = vmatpush3.bf16.msra.mxu0 %v2308_v9 }
 0x28d   : > { %3621 = vmatpush3.bf16.msra.mxu1 %v2312_v29 }
 0x28e   : > { %3622 = vmatprep.subr.bf16.mxu1 %v2313_v31 }
 0x28f   : > { %3607 = vmatmul.mubr.bf16.vlgmr.msra.gmra.mrb[72].mxu0 %v2278_v4 }
 0x290   : > { %3610 = vmatprep.mubr.bf16.mxu0 %v2279_v23  ;;  %v3540_v2 = vpop.f32.mrb[60].mxu1 }
 0x291   : > { %3623 = vmatpush3.bf16.msra.mxu1 %v2313_v31  ;;  %v2254_v18 = vpop.f32.mrb[61].mxu1 }
 0x292   : > { %v3541_v27 = vpop.f32.mrb[62].mxu1  ;;  %3624 = vmatprep.subr.bf16.mxu1 %v2314_v47 }
 0x293   : > { %v2316_v33 = vpack.c.bf16 %v3541_v27, %v3540_v2  ;;  %v2257_v48 = vpop.f32.mrb[63].mxu1 }
 0x294   : > { %v2315_v25 = vpack.c.bf16 %v2257_v48, %v2254_v18 }
 0x295   : > { %3625 = vmatpush3.bf16.msra.mxu1 %v2314_v47 }
 0x296   : > { %3626 = vmatprep.subr.bf16.mxu1 %v2315_v25 }
 0x297   : > { %3611 = vmatmul.mubr.bf16.gmra.mrb[76].mxu0 %v2280_v22 }
 0x299   : > { %3627 = vmatpush3.bf16.msra.mxu1 %v2315_v25 }
 0x29a   : > { %3628 = vmatprep.subr.bf16.mxu1 %v2316_v33 }
 0x29d   : > { %3629 = vmatpush3.bf16.msra.mxu1 %v2316_v33 }
 0x2a0   : > { %3631 = vmatmul.mubr.bf16.vlgmr.msra.gmra.mrb[72].mxu1 %v2282_v62 }
 0x2a1   : > { %3634 = vmatprep.mubr.bf16.mxu1 %v2283_v42 }
 0x2a8   : > { %3635 = vmatmul.mubr.bf16.gmra.mrb[76].mxu1 %v2284_v21 }
 0x341   : > { %v4813_v38 = vpop.f32.mrb[64].mxu0 }
 0x342   : > { %3847 = vrcp.f32 %v4813_v38  ;;  %v4816_v4 = vpop.f32.mrb[65].mxu0 }
 0x343   : > { %3849 = vrcp.f32 %v4816_v4  ;;  %v4819_v8 = vpop.f32.mrb[66].mxu0 }
 0x344   : > { %v4821_v7 = vpop.f32.mrb[67].mxu0  ;;  %3851 = vrcp.f32 %v4819_v8 }
 0x345   : > { %3853 = vrcp.f32 %v4821_v7 }
 0x349   : > { %v4824_v15 = vpop.f32.mrb[68].mxu0 }
 0x34a   : > { %v4827_v62 = vpop.f32.mrb[69].mxu0  ;;  %3855 = vrcp.f32 %v4824_v15 }
 0x34b   : > { %v4829_v53 = vpop.f32.mrb[70].mxu0  ;;  %3857 = vrcp.f32 %v4827_v62 }
 0x34c   : > { %v3848_v43 = vpop.eup %3847  ;;  %v4831_v23 = vpop.f32.mrb[71].mxu0 }
 0x34d   : > { %v3850_v63 = vpop.eup %3849  ;;  %2621 = vperm.xlu1 %3701, %v3848_v43  }
 0x34e   : > { %2611 = vperm.xlu0 %3702, %v3850_v63   ;;  %v3852_v1 = vpop.eup %3851 }
 0x34f   : > { %v3854_v11 = vpop.eup %3853 }
 0x351   : > { %2626 = vperm.xlu1 %3701, %v3852_v1  }
 0x352   : > { %v4835_v22 = vpop.f32.mrb[64].mxu1 }
 0x353   : > { %3859 = vrcp.f32 %v4835_v22  ;;  %v4838_v60 = vpop.f32.mrb[65].mxu1 }
 0x354   : > { %v4840_v42 = vpop.f32.mrb[66].mxu1  ;;  %3861 = vrcp.f32 %v4831_v23  ;;  %v3856_v21 = vpop.eup %3855 }
 0x355   : > { %v4842_v49 = vpop.f32.mrb[67].mxu1  ;;  %2616 = vperm.xlu1 %3701, %v3854_v11   ;;  %3863 = vrcp.f32 %v4838_v60  ;;  %v3858_v52 = vpop.eup %3857 }
 0x359   : > { %2641 = vperm.xlu1 %3701, %v3856_v21  }
 0x35a   : > { %v4846_v3 = vpop.f32.mrb[68].mxu1 }
 0x35b   : > { %3865 = vrcp.f32 %v4846_v3  ;;  %v4849_v14 = vpop.f32.mrb[69].mxu1 }
 0x35c   : > { %v4851_v6 = vpop.f32.mrb[70].mxu1  ;;  %3867 = vrcp.f32 %v4840_v42 }
 0x35d   : > { %v3860_v41 = vpop.eup %3859  ;;  %v4853_v46 = vpop.f32.mrb[71].mxu1  ;;  %2631 = vperm.xlu1 %3701, %v3858_v52   ;;  %3869 = vrcp.f32 %v4849_v14 }
 0x35e   : > { %2661 = vperm.xlu0 %3702, %v3860_v41   ;;  %v3862_v0 = vpop.eup %3861  ;;  %3871 = vrcp.f32 %v4842_v49 }
 0x35f   : > { %v3864_v12 = vpop.eup %3863 }
 0x361   : > { %2636 = vperm.xlu1 %3701, %v3862_v0  }
 0x362   : > { %v4858_v58 = vpop.f32.mrb[72].mxu0 }
 0x363   : > { %3873 = vrcp.f32 %v4858_v58  ;;  %v4861_v26 = vpop.f32.mrb[73].mxu0 }
 0x364   : > { %v4863_v55 = vpop.f32.mrb[74].mxu0  ;;  %3875 = vrcp.f32 %v4851_v6 }
 0x365   : > { %v3866_v61 = vpop.eup %3865  ;;  %v4865_v5 = vpop.f32.mrb[75].mxu0  ;;  %2651 = vperm.xlu1 %3701, %v3864_v12   ;;  %3877 = vrcp.f32 %v4861_v26 }
 0x366   : > { %2681 = vperm.xlu0 %3702, %v3866_v61   ;;  %v3868_v44 = vpop.eup %3867  ;;  %3879 = vrcp.f32 %v4853_v46 }
 0x367   : > { %v3870_v10 = vpop.eup %3869 }
 0x368   : > { %v3872_v16 = vpop.eup %3871 }
 0x369   : > { %2666 = vperm.xlu1 %3701, %v3868_v44  }
 0x36a   : > { %2671 = vperm.xlu0 %3702, %v3870_v10   ;;  %v4870_v17 = vpop.f32.mrb[76].mxu0 }
 0x36b   : > { %3881 = vrcp.f32 %v4870_v17  ;;  %v4873_v34 = vpop.f32.mrb[77].mxu0 }
 0x36c   : > { %v4875_v36 = vpop.f32.mrb[78].mxu0  ;;  %3883 = vrcp.f32 %v4863_v55 }
 0x36d   : > { %v3874_v30 = vpop.eup %3873  ;;  %v4877_v45 = vpop.f32.mrb[79].mxu0  ;;  %2656 = vperm.xlu1 %3701, %v3872_v16   ;;  %3885 = vrcp.f32 %v4873_v34 }
 0x36e   : > { %2701 = vperm.xlu0 %3702, %v3874_v30   ;;  %v3876_v35 = vpop.eup %3875  ;;  %3887 = vrcp.f32 %v4865_v5 }
 0x36f   : > { %v3878_v59 = vpop.eup %3877 }
 0x370   : > { %v3880_v40 = vpop.eup %3879 }
 0x371   : > { %2686 = vperm.xlu1 %3701, %v3876_v35  }
 0x372   : > { %2691 = vperm.xlu0 %3702, %v3878_v59  }
 0x373   : > { %v4882_v57 = vpop.f32.mrb[72].mxu1 }
 0x374   : > { %3889 = vrcp.f32 %v4882_v57  ;;  %v4885_v51 = vpop.f32.mrb[73].mxu1 }
 0x375   : > { %v3882_v56 = vpop.eup %3881  ;;  %v4887_v19 = vpop.f32.mrb[74].mxu1  ;;  %2676 = vperm.xlu1 %3701, %v3880_v40   ;;  %3891 = vrcp.f32 %v4875_v36 }
 0x376   : > { %v4890_v9 = vpop.f32.mrb[75].mxu1  ;;  %2721 = vperm.xlu0 %3702, %v3882_v56   ;;  %v3884_v29 = vpop.eup %3883  ;;  %3893 = vrcp.f32 %v4885_v51 }
 0x377   : > { %v3886_v24 = vpop.eup %3885  ;;  %3895 = vrcp.f32 %v4877_v45 }
 0x378   : > { %v3888_v39 = vpop.eup %3887 }
 0x379   : > { %2706 = vperm.xlu1 %3701, %v3884_v29  }
 0x37a   : > { %2711 = vperm.xlu0 %3702, %v3886_v24  }
 0x37b   : > { %v4894_v20 = vpop.f32.mrb[76].mxu1 }
 0x37c   : > { %v4896_v28 = vpop.f32.mrb[77].mxu1 }
 0x37d   : > { %3897 = vrcp.f32 %v4896_v28  ;;  %v4899_v54 = vpop.f32.mrb[78].mxu1  ;;  %2696 = vperm.xlu1 %3701, %v3888_v39  }
 0x37e   : > { %v3890_v32 = vpop.eup %3889  ;;  %3899 = vrcp.f32 %v4887_v19  ;;  %v4902_v50 = vpop.f32.mrb[79].mxu1 }
 0x37f   : > { %2741 = vperm.xlu0 %3702, %v3890_v32   ;;  %v3892_v47 = vpop.eup %3891  ;;  %3901 = vrcp.f32 %v4894_v20 }
 0x380   : > { %v3894_v13 = vpop.eup %3893  ;;  %3903 = vrcp.f32 %v4890_v9 }
 0x381   : > { %2726 = vperm.xlu1 %3701, %v3892_v47   ;;  %v3896_v31 = vpop.eup %3895  ;;  %3905 = vrcp.f32 %v4829_v53 }
 0x382   : > { %3907 = vrcp.f32 %v4902_v50 }
 0x383   : > { %2731 = vperm.xlu0 %3702, %v3894_v13   ;;  %3909 = vrcp.f32 %v4899_v54 }
 0x385   : > { %2716 = vperm.xlu1 %3701, %v3896_v31  }
 0x387   : > { %v3898_v2 = vpop.eup %3897 }
 0x388   : > { %v3900_v18 = vpop.eup %3899  ;;  %2751 = vperm.xlu0 %3702, %v3898_v2  }
 0x389   : > { %2746 = vperm.xlu1 %3701, %v3900_v18   ;;  %v3902_v27 = vpop.eup %3901 }
 0x38a   : > { %v3904_v33 = vpop.eup %3903 }
 0x38b   : > { %v3906_v48 = vpop.eup %3905 }
 0x38c   : > { %2761 = vperm.xlu0 %3702, %v3902_v27   ;;  %v3908_v25 = vpop.eup %3907 }
 0x38d   : > { %2736 = vperm.xlu1 %3701, %v3904_v33   ;;  %v3910_v37 = vpop.eup %3909 }
 0x390   : > { %2646 = vperm.xlu0 %3702, %v3906_v48  }
 0x391   : > { %2756 = vperm.xlu1 %3701, %v3908_v25  }
 0x395   : > { %2766 = vperm.xlu1 %3701, %v3910_v37  }
 0x3cc   : > { %v2622_v43 = vpop.permute.xlu1 %2621 }
 0x3cd   : > { %v4910_v63 = vmul.f32 %v4813_v38, %v2622_v43  ;;  %v2612_v1 = vpop.permute.xlu0 %2611 }
 0x3ce   : > { %v4913_v11 = vmul.f32 %v2612_v1, %v4816_v4 }
 0x3d0   : > { %v2627_v21 = vpop.permute.xlu1 %2626 }
 0x3d1   : > { %v4916_v52 = vmul.f32 %v4819_v8, %v2627_v21 }
 0x3d4   : > { %v2617_v41 = vpop.permute.xlu1 %2616 }
 0x3d5   : > { %v4919_v0 = vmul.f32 %v2617_v41, %v4821_v7 }
 0x3d8   : > { %v2642_v12 = vpop.permute.xlu1 %2641 }
 0x3d9   : > { %v4922_v61 = vmul.f32 %v4824_v15, %v2642_v12 }
 0x3dc   : > { %v2632_v44 = vpop.permute.xlu1 %2631 }
 0x3dd   : > { %v2662_v10 = vpop.permute.xlu0 %2661  ;;  %v4925_v38 = vmul.f32 %v2632_v44, %v4827_v62 }
 0x3de   : > { %v2779_v4 = vmul.f32 %v4835_v22, %v2662_v10 }
 0x3e0   : > { %2813 = vrot.lane.b32.xlu1 %v2779_v4, %s3977_s30  ;;  %v2637_v8 = vpop.permute.xlu1 %2636 }
 0x3e1   : > { %v4930_v16 = vmul.f32 %v2637_v8, %v4831_v23 }
 0x3e4   : > { %v2652_v7 = vpop.permute.xlu1 %2651 }
 0x3e5   : > { %v2682_v30 = vpop.permute.xlu0 %2681  ;;  %v2777_v35 = vmul.f32 %v2652_v7, %v4838_v60 }
 0x3e6   : > { %v2783_v59 = vmul.f32 %v4846_v3, %v2682_v30 }
 0x3e7   : > { %2809 = vrot.lane.b32.xlu1 %v2777_v35, %s3977_s30 }
 0x3e8   : > { %v2667_v15 = vpop.permute.xlu1 %2666 }
 0x3e9   : > { %v2672_v62 = vpop.permute.xlu0 %2671  ;;  %v2780_v40 = vmul.f32 %v4840_v42, %v2667_v15 }
 0x3ea   : > { %v2781_v23 = vmul.f32 %v2672_v62, %v4849_v14 }
 0x3eb   : > { %2815 = vrot.lane.b32.xlu0 %v2780_v40, %s3977_s30  ;;  %2821 = vrot.lane.b32.xlu1 %v2783_v59, %s3977_s30 }
 0x3ec   : > { %v2657_v22 = vpop.permute.xlu1 %2656 }
 0x3ed   : > { %v2778_v56 = vmul.f32 %v2657_v22, %v4842_v49  ;;  %v2702_v29 = vpop.permute.xlu0 %2701 }
 0x3ee   : > { %v2787_v3 = vmul.f32 %v4858_v58, %v2702_v29 }
 0x3ef   : > { %2811 = vrot.lane.b32.xlu0 %v2778_v56, %s3977_s30  ;;  %2817 = vrot.lane.b32.xlu1 %v2781_v23, %s3977_s30 }
 0x3f0   : > { %v2687_v60 = vpop.permute.xlu1 %2686 }
 0x3f1   : > { %v2784_v24 = vmul.f32 %v4851_v6, %v2687_v60  ;;  %v2692_v42 = vpop.permute.xlu0 %2691 }
 0x3f2   : > { %v2785_v14 = vmul.f32 %v2692_v42, %v4861_v26 }
 0x3f3   : > { %2823 = vrot.lane.b32.xlu0 %v2784_v24, %s3977_s30  ;;  %2845 = vrot.lane.b32.xlu1 %v2787_v3, %s3978_s5 }
 0x3f4   : > { %v2677_v39 = vpop.permute.xlu1 %2676 }
 0x3f5   : > { %v2782_v49 = vmul.f32 %v2677_v39, %v4853_v46  ;;  %v2722_v32 = vpop.permute.xlu0 %2721 }
 0x3f6   : > { %v2791_v58 = vmul.f32 %v4870_v17, %v2722_v32 }
 0x3f7   : > { %2819 = vrot.lane.b32.xlu0 %v2782_v49, %s3977_s30  ;;  %2841 = vrot.lane.b32.xlu1 %v2785_v14, %s3978_s5 }
 0x3f8   : > { %v2707_v47 = vpop.permute.xlu1 %2706 }
 0x3f9   : > { %v2788_v6 = vmul.f32 %v4863_v55, %v2707_v47  ;;  %v2712_v13 = vpop.permute.xlu0 %2711 }
 0x3fa   : > { %v2789_v26 = vmul.f32 %v2712_v13, %v4873_v34 }
 0x3fb   : > { %2847 = vrot.lane.b32.xlu0 %v2788_v6, %s3978_s5  ;;  %2853 = vrot.lane.b32.xlu1 %v2791_v58, %s3978_s5 }
 0x3fc   : > { %v2697_v31 = vpop.permute.xlu1 %2696 }
 0x3fd   : > { %v2786_v46 = vmul.f32 %v2697_v31, %v4865_v5 }
 0x3fe   : > { %v2742_v2 = vpop.permute.xlu0 %2741 }
 0x3ff   : > { %2843 = vrot.lane.b32.xlu0 %v2786_v46, %s3978_s5  ;;  %2849 = vrot.lane.b32.xlu1 %v2789_v26, %s3978_s5  ;;  %v2795_v17 = vmul.f32 %v4882_v57, %v2742_v2 }
 0x400   : > { %v2727_v18 = vpop.permute.xlu1 %2726 }
 0x401   : > { %v2792_v55 = vmul.f32 %v4875_v36, %v2727_v18 }
 0x402   : > { %v2732_v27 = vpop.permute.xlu0 %2731 }
 0x403   : > { %2855 = vrot.lane.b32.xlu0 %v2792_v55, %s3978_s5  ;;  %2877 = vrot.lane.b32.xlu1 %v2795_v17, %s3979_s6  ;;  %v2793_v34 = vmul.f32 %v2732_v27, %v4885_v51 }
 0x404   : > { %v2717_v33 = vpop.permute.xlu1 %2716 }
 0x405   : > { %v2790_v5 = vmul.f32 %v2717_v33, %v4877_v45 }
 0x407   : > { %v2752_v48 = vpop.permute.xlu0 %2751  ;;  %2851 = vrot.lane.b32.xlu0 %v2790_v5, %s3978_s5  ;;  %2873 = vrot.lane.b32.xlu1 %v2793_v34, %s3979_s6 }
 0x408   : > { %v2747_v25 = vpop.permute.xlu1 %2746  ;;  %v2797_v37 = vmul.f32 %v2752_v48, %v4896_v28 }
 0x409   : > { %v2796_v57 = vmul.f32 %v4887_v19, %v2747_v25 }
 0x40b   : > { %v2762_v36 = vpop.permute.xlu0 %2761  ;;  %2879 = vrot.lane.b32.xlu0 %v2796_v57, %s3979_s6  ;;  %2881 = vrot.lane.b32.xlu1 %v2797_v37, %s3979_s6 }
 0x40c   : > { %v2737_v43 = vpop.permute.xlu1 %2736  ;;  %v2799_v1 = vmul.f32 %v4894_v20, %v2762_v36 }
 0x40d   : > { %v2794_v21 = vmul.f32 %v2737_v43, %v4890_v9 }
 0x40f   : > { %2875 = vrot.lane.b32.xlu0 %v2794_v21, %s3979_s6  ;;  %2885 = vrot.lane.b32.xlu1 %v2799_v1, %s3979_s6  ;;  %v2647_v12 = vpop.permute.xlu0 %2646 }
 0x410   : > { %v2757_v45 = vpop.permute.xlu1 %2756  ;;  %v2776_v17 = vmul.f32 %v4829_v53, %v2647_v12 }
 0x411   : > { %v2798_v51 = vmul.f32 %v2757_v45, %v4902_v50 }
 0x413   : > { %2883 = vrot.lane.b32.xlu0 %v2798_v51, %s3979_s6 }
 0x414   : > { %v2767_v41 = vpop.permute.xlu1 %2766 }
 0x415   : > { %v2800_v28 = vmul.f32 %v4899_v54, %v2767_v41 }
 0x417   : > { %2887 = vrot.lane.b32.xlu0 %v2800_v28, %s3979_s6 }
 0x452   : > { %v2814_v19 = vpop.permute.xlu1 %2813 }
 0x453   : > { %v2899_v54 = vsel %vm293_vm0, %v4910_v63, %v2814_v19 }
 0x459   : > { %v2810_v44 = vpop.permute.xlu1 %2809 }
 0x45a   : > { %v2897_v29 = vsel %vm293_vm0, %v4913_v11, %v2810_v44 }
 0x45d   : > { %v2816_v10 = vpop.permute.xlu0 %2815  ;;  %v2822_v4 = vpop.permute.xlu1 %2821 }
 0x45e   : > { %v2900_v42 = vsel %vm293_vm0, %v4916_v52, %v2816_v10  ;;  %v2903_v52 = vsel %vm293_vm0, %v4922_v61, %v2822_v4 }
 0x461   : > { %v2812_v20 = vpop.permute.xlu0 %2811  ;;  %v2818_v8 = vpop.permute.xlu1 %2817 }
 0x462   : > { %v2901_v39 = vsel %vm293_vm0, %v4925_v38, %v2818_v8  ;;  %v2898_v38 = vsel %vm293_vm0, %v4919_v0, %v2812_v20 }
 0x465   : > { %v2824_v9 = vpop.permute.xlu0 %2823  ;;  %v2846_v7 = vpop.permute.xlu1 %2845 }
 0x466   : > { %v2907_v40 = vsel %vm1664_vm2, %v2899_v54, %v2846_v7  ;;  %v2904_v27 = vsel %vm293_vm0, %v2776_v17, %v2824_v9 }
 0x469   : > { %v2820_v30 = vpop.permute.xlu0 %2819  ;;  %v2842_v35 = vpop.permute.xlu1 %2841 }
 0x46a   : > { %v2905_v60 = vsel %vm1664_vm2, %v2897_v29, %v2842_v35  ;;  %v2902_v61 = vsel %vm293_vm0, %v4930_v16, %v2820_v30 }
 0x46d   : > { %v2848_v15 = vpop.permute.xlu0 %2847  ;;  %v2854_v50 = vpop.permute.xlu1 %2853 }
 0x46e   : > { %v2908_v14 = vsel %vm1664_vm2, %v2900_v42, %v2848_v15  ;;  %v2911_v6 = vsel %vm1664_vm2, %v2903_v52, %v2854_v50 }
 0x471   : > { %v2844_v59 = vpop.permute.xlu0 %2843  ;;  %v2850_v62 = vpop.permute.xlu1 %2849 }
 0x472   : > { %v2909_v49 = vsel %vm1664_vm2, %v2901_v39, %v2850_v62  ;;  %v2906_v13 = vsel %vm1664_vm2, %v2898_v38, %v2844_v59 }
 0x475   : > { %v2856_v22 = vpop.permute.xlu0 %2855  ;;  %v2878_v23 = vpop.permute.xlu1 %2877 }
 0x476   : > { %v2916_v56 = vsel %vm2913_vm3, %v2907_v40, %v2878_v23  ;;  %v2912_v16 = vsel %vm1664_vm2, %v2904_v27, %v2856_v22 }
 0x477   : > { %2924 = vst [vmem:[%s4977_s9 + $0x10] sm:$0xff] %v2916_v56 }
 0x479   : > { %v2852_v3 = vpop.permute.xlu0 %2851  ;;  %v2874_v63 = vpop.permute.xlu1 %2873 }
 0x47a   : > { %v2914_v24 = vsel %vm2913_vm3, %v2905_v60, %v2874_v63  ;;  %v2910_v0 = vsel %vm1664_vm2, %v2902_v61, %v2852_v3 }
 0x47b   : > { %2922 = vst [vmem:[%s4977_s9] sm:$0xff] %v2914_v24 }
 0x47d   : > { %v2880_v11 = vpop.permute.xlu0 %2879  ;;  %v2882_v32 = vpop.permute.xlu1 %2881 }
 0x47e   : > { %v2917_v47 = vsel %vm2913_vm3, %v2908_v14, %v2880_v11  ;;  %v2918_v58 = vsel %vm2913_vm3, %v2909_v49, %v2882_v32 }
 0x47f   : > { %2925 = vst [vmem:[%s4977_s9 + $0x18] sm:$0xff] %v2917_v47  ;;  %2926 = vst [vmem:[%s4977_s9 + $0x20] sm:$0xff] %v2918_v58 }
 0x481   : > { %v2876_v31 = vpop.permute.xlu0 %2875  ;;  %v2886_v26 = vpop.permute.xlu1 %2885 }
 0x482   : > { %v2915_v46 = vsel %vm2913_vm3, %v2906_v13, %v2876_v31  ;;  %v2920_v2 = vsel %vm2913_vm3, %v2911_v6, %v2886_v26 }
 0x483   : > { %2923 = vst [vmem:[%s4977_s9 + $0x8] sm:$0xff] %v2915_v46  ;;  %2928 = vst [vmem:[%s4977_s9 + $0x30] sm:$0xff] %v2920_v2 }
 0x485   : > { %v2884_v18 = vpop.permute.xlu0 %2883 }
 0x486   : > { %v2919_v55 = vsel %vm2913_vm3, %v2910_v0, %v2884_v18 }
 0x487   : > { %2927 = vst [vmem:[%s4977_s9 + $0x28] sm:$0xff] %v2919_v55 }
 0x489   : > { %v2888_v33 = vpop.permute.xlu0 %2887 }
 0x48a   : > { %v2921_v53 = vsel %vm2913_vm3, %v2912_v16, %v2888_v33 }
 0x48b   : > { %2929 = vst [vmem:[%s4977_s9 + $0x38] sm:$0xff] %v2921_v53 }
 0x48c   : > { %3924 = shalt.err (!%p3921_p3)
}
 0x48d   : > { %s3925_s28 = scalar_lea.hbm %s5017_s14, 1024  ;;  %s3929_s5 = scalar_lea.hbm %s5071_s4, 2048 }
 0x48e   : > { %p3926_p4 = scmp.ne.s32.totalorder %s5017_s14, %s3925_s28  ;;  %p3930_p9 = scmp.lt.u32.totalorder %s5017_s14, %s5071_s4 }
 0x48f   : > { %p3931_p10 = scmp.lt.u32.totalorder %s3929_s5, %s3925_s28  ;;  %p3933_p12 = scmp.lt.u32.totalorder %s3925_s28, %s5017_s14 }
 0x490   : > { %p3927_p7 = pnand %p3926_p4, %p4046_p5 }
 0x491   : > { %p3932_p11 = por %p3931_p10, %p3930_p9 }
 0x492   : > { %p3928_p8 = pneg %p3927_p7 }
 0x493   : > { %p3934_p13 = por %p3933_p12, %p3932_p11 }
 0x495   : > { %p3935_p0 = pnand %p3934_p13, %p3928_p8 }
 0x497   : > { %3938 = shalt.err (!%p3935_p0)
}
 0x498   : > { %s3981_s8 = smov 128   ;;  %s3982_s9 = smov 8  }
 0x499   : > { %3654 = dma.vmem_to_hbm [thread:$0]  (%p4046_p5), %s5019_s11, 1024, %s5017_s14, %s5026_s19, %s3981_s8, %s3981_s8, %s3982_s9  }
 0x49a PF: > { %p3660_p1 = scmp.ge.s32.totalorder %s3973_s18, 2  ;;  %s2959_s10 = sand.u32 1, %s3961_s15  }
 0x49b   : > { %s2960_s12 = scalar_lea.sflag [#allocation3], %s2959_s10 }
 0x49c   : > { %p3657_p2 = pnand %p3660_p1, %p4050_p6 }
 0x49e   : > { %3956 = dma.done.wait (!%p3657_p2), %s2960_s12, 1024  }
 0x49f   : > { %3958 = vsyncadd (!%p3657_p2), %s2960_s12, 4294966272  ;;  %p14_p3 = scmp.ge.s32.totalorder %s4033_s21, 4   ;;  %s5083_s15 = smov %s3965_s16 }
 0x4a0   : > { %s5084_s16 = smov %s3969_s17  ;;  %s5085_s17 = smov %s4044_s24 }
 0x4a1   : > { %s5086_s18 = smov %s4033_s21  ;;  %16 = sbr.rel (!%p14_p3) target bundleno = 3 (0x3), region = 77 }
 0x4a8   :  { %2965 = vsyncpa [#allocation3], 1 }
 0x4a9   :  { %2967 = vsyncpa [#allocation3 + $0x1], 1 }

</bundles_post_ra>
